<compile_context>
chip_gen: v6e
topology: v6e:2x2x1
jax: 0.10.0
libtpu: 0.0.40
codegen_flags: <defaults>
</compile_context>

<pallas_src>
import jax
import jax.numpy as jnp
from jax.experimental import pallas as pl
from jax.experimental.pallas import tpu as pltpu  # TPU backend (no scratch/semaphores needed here)


# ----------------------------- helpers -----------------------------

def _bias_offsets(c1, c2, c3, hp, f1):
    """Lane-128-aligned offsets of the six packed biases: conv1, conv2, conv3, lstm, fc1, fc2."""
    o1 = 0
    o2 = ((c1 + 127) // 128) * 128
    o3 = o2 + c2
    ol = o3 + c3
    of1 = ol + 4 * hp
    of2 = of1 + f1
    total = of2 + 128
    return o1, o2, o3, ol, of1, of2, total


# ----------------------------- fused Pallas kernel -----------------------------

def cnn_lstm_kernel(x_ref, w1_ref, w2_ref, w3_ref, wih_ref, whh_ref,
                    wf1_ref, wf2_ref, bias_ref, out_ref):
    """Whole CnnLstm forward for the full batch in one grid-less kernel invocation.

    Layouts (batch-folded, time-major: activation row = t*B + b):
      x_ref   : (4*B*T, 3*CP1) bf16 - conv1 im2col taps, the 4 output parities stacked on sublanes.
      w1_ref  : (3*CP1, 64)    bf16 - conv1 taps stacked along K.
      w2_ref  : (3*64, 128)    bf16 - conv2 taps stacked along K.
      w3_ref  : (3*128, 128)   bf16 - conv3 taps stacked along K.
      wih_ref : (128, 4*HP)    bf16 - LSTM input weights, gate order (i, f, o, g), HP = 128.
      whh_ref : (HP, 4*HP)     bf16 - LSTM recurrent weights, same gate order/padding.
      wf1_ref : (HP, 128)      bf16 - fc1 (zero rows for the padded hidden lanes).
      wf2_ref : (128, 128)     bf16 - fc2 padded to 128 output lanes (cols >= NC are zero).
      bias_ref: (1, total)     f32  - all six biases packed at 128-lane-aligned offsets.
      out_ref : (B, 128)       f32  - lane-dense output; cols >= NC sliced off in the wrapper.
    """
    f32 = jnp.float32
    bf16 = jnp.bfloat16
    B = out_ref.shape[0]
    BT = x_ref.shape[0] // 4            # B * T
    T = BT // B
    HP = whh_ref.shape[0]               # padded LSTM hidden (128)
    C1 = w1_ref.shape[1]                # 64
    C2 = w2_ref.shape[1]                # 128
    C3 = w3_ref.shape[1]                # 128
    F1 = wf1_ref.shape[1]               # 128
    o1, o2, o3, ol, of1, of2, _ = _bias_offsets(C1, C2, C3, HP, F1)

    def mxu(a, b):                      # bf16 operands, f32 accumulation on the MXU
        return jnp.dot(a.astype(bf16), b, preferred_element_type=f32)

    b1 = bias_ref[:, o1:o1 + C1]
    b2 = bias_ref[:, o2:o2 + C2]
    b3 = bias_ref[:, o3:o3 + C3]
    bl = bias_ref[:, ol:ol + 4 * HP]
    bf1 = bias_ref[:, of1:of1 + F1]
    bf2 = bias_ref[:, of2:of2 + 128]

    # Per-sample time shifts on the time-major (BT, C) slab: rows of time step t-1 / t+1 with
    # zero rows at the sequence boundary (the conv "padding=1" rows). Pure in-register ops.
    def shift_prev(a):
        z = jnp.zeros((B, a.shape[1]), a.dtype)
        return jnp.concatenate([z, a[:BT - B, :]], axis=0)

    def shift_next(a):
        z = jnp.zeros((B, a.shape[1]), a.dtype)
        return jnp.concatenate([a[B:, :], z], axis=0)

    # ---- conv1 (k=3, pad=1) + ReLU + MaxPool(2): 4 output parities in ONE matmul ----
    c_all = mxu(x_ref[...], w1_ref[...])                     # (4*BT, 64)
    c0 = c_all[0 * BT:1 * BT]                                # conv1 @ positions 4t
    c1 = c_all[1 * BT:2 * BT]                                # 4t + 1
    c2 = c_all[2 * BT:3 * BT]                                # 4t + 2
    c3 = c_all[3 * BT:4 * BT]                                # 4t + 3
    # relu(maxpool(.)) == max(relu(.)); bias is parity-independent so it is added after the max.
    a1_e = jnp.maximum(jnp.maximum(c0, c1) + b1, 0.0)        # pooled even rows, (BT, 64)
    a1_o = jnp.maximum(jnp.maximum(c2, c3) + b1, 0.0)        # pooled odd rows,  (BT, 64)

    # ---- conv2 (k=3, pad=1) + ReLU + MaxPool(2): taps lane-concat, parities stacked, ONE matmul ----
    x2e = jnp.concatenate([shift_prev(a1_o), a1_e, a1_o], axis=1)      # (BT, 192)
    x2o = jnp.concatenate([a1_e, a1_o, shift_next(a1_e)], axis=1)      # (BT, 192)
    c2_all = mxu(jnp.concatenate([x2e, x2o], axis=0), w2_ref[...])     # (2*BT, 128)
    a2 = jnp.maximum(jnp.maximum(c2_all[:BT], c2_all[BT:]) + b2, 0.0)  # (BT, 128)

    # ---- conv3 (k=3, pad=1) + ReLU: taps lane-concat, ONE matmul ----
    x3c = jnp.concatenate([shift_prev(a2), a2, shift_next(a2)], axis=1)  # (BT, 384)
    h3 = jnp.maximum(mxu(x3c, w3_ref[...]) + b3, 0.0)                    # (BT, 128)

    # ---- LSTM: input projection hoisted out of the recurrence ----
    gx = mxu(h3, wih_ref[...]) + bl                          # (BT, 4*HP), gates (i, f, o, g)
    whh = whh_ref[...]
    h = jnp.zeros((B, HP), f32)
    c = jnp.zeros((B, HP), f32)
    # TODO(synk): whh could be held MXU-weight-stationary across steps via
    # pltpu.matmul_push_rhs / matmul_acc_lhs / matmul_pop once that path is validated.
    for t in range(T):                                       # T is tiny & static -> unrolled
        g = gx[t * B:(t + 1) * B, :] + mxu(h, whh)           # (B, 4*HP)
        sig = jax.nn.sigmoid(g[:, :3 * HP])                  # one contiguous sigmoid slab
        i_g = sig[:, 0:HP]
        f_g = sig[:, HP:2 * HP]
        o_g = sig[:, 2 * HP:3 * HP]
        g_g = jnp.tanh(g[:, 3 * HP:])                        # tanh on the last 128 lanes
        c = f_g * c + i_g * g_g
        h = o_g * jnp.tanh(c)
    # Padded lanes of h/c provably stay exactly 0 (zero gate weights/bias -> 0.5 * 0 products),
    # and fc1 has zero rows for those lanes.

    # ---- head: fc1 + ReLU + fc2 (both batch rows at once, single lane-dense store) ----
    # TODO(synk): nn.Dropout(0.5) is identity at inference; training-mode RNG dropout not implemented.
    z = jnp.maximum(mxu(h, wf1_ref[...]) + bf1, 0.0)         # (B, 128)
    out_ref[...] = mxu(z, wf2_ref[...]) + bf2                # (B, 128)


def cnn_lstm_forward(x1in, params, batch, num_classes):
    """Single grid-less pallas_call running the whole forward; everything VMEM-resident."""
    w1s, w2s, w3s, wih_p, whh_p, wf1_p, wf2_p, bias_packed = params
    out = pl.pallas_call(
        cnn_lstm_kernel,
        out_shape=jax.ShapeDtypeStruct((batch, 128), jnp.float32),
    )(x1in, w1s, w2s, w3s, wih_p, whh_p, wf1_p, wf2_p, bias_packed)
    return out[:, :num_classes]


# ----------------------------- main -----------------------------

if __name__ == "__main__":
    B, CIN, SEQ, NC = 2, 1, 16, 5            # (B, in_channels, seq_len), num_classes
    H, HP, LSTM_IN = 100, 128, 128           # lstm_hidden=100, padded to 128
    CP1 = 8                                  # conv1 input channels padded 1 -> 8
    T = SEQ // 4                             # LSTM sequence length
    BT = B * T

    key = jax.random.PRNGKey(0)
    ks = jax.random.split(key, 16)
    s = 0.1
    # --- logical parameters (PyTorch shapes), deterministic init ---
    w_c1 = s * jax.random.normal(ks[0], (64, CIN, 3), jnp.float32)
    b_c1 = s * jax.random.normal(ks[1], (64,), jnp.float32)
    w_c2 = s * jax.random.normal(ks[2], (128, 64, 3), jnp.float32)
    b_c2 = s * jax.random.normal(ks[3], (128,), jnp.float32)
    w_c3 = s * jax.random.normal(ks[4], (128, 128, 3), jnp.float32)
    b_c3 = s * jax.random.normal(ks[5], (128,), jnp.float32)
    w_ih = s * jax.random.normal(ks[6], (4 * H, LSTM_IN), jnp.float32)
    w_hh = s * jax.random.normal(ks[7], (4 * H, H), jnp.float32)
    b_ih = s * jax.random.normal(ks[8], (4 * H,), jnp.float32)
    b_hh = s * jax.random.normal(ks[9], (4 * H,), jnp.float32)
    w_fc1 = s * jax.random.normal(ks[10], (128, H), jnp.float32)
    b_fc1 = s * jax.random.normal(ks[11], (128,), jnp.float32)
    w_fc2 = s * jax.random.normal(ks[12], (NC, 128), jnp.float32)
    b_fc2 = s * jax.random.normal(ks[13], (NC,), jnp.float32)
    x = jax.random.normal(ks[14], (B, CIN, SEQ), jnp.float32)

    # --- kernel-form parameters (bf16 weights, one packed f32 bias vector) ---
    def conv_w_stack(w, cin_pad=None):
        # (Cout, Cin, K=3) -> (K * Cin_pad, Cout): row-block k holds tap k, matching the
        # in-kernel lane order [prev, curr, next].
        cout, cin, kk = w.shape
        taps = []
        for k in range(kk):
            wk = jnp.transpose(w[:, :, k])               # (Cin, Cout)
            if cin_pad is not None:
                wk = jnp.pad(wk, ((0, cin_pad - cin), (0, 0)))
            taps.append(wk)
        return jnp.concatenate(taps, axis=0)

    w1s = conv_w_stack(w_c1, CP1).astype(jnp.bfloat16)   # (24, 64)
    w2s = conv_w_stack(w_c2).astype(jnp.bfloat16)        # (192, 128)
    w3s = conv_w_stack(w_c3).astype(jnp.bfloat16)        # (384, 128)

    # LSTM weights: gates reordered (PyTorch i,f,g,o -> kernel i,f,o,g), each gate padded to a
    # 128-lane slot so gate splits sit on lane boundaries; padded columns have zero weight/bias.
    gate_src = (0, 1, 3, 2)                              # kernel slot -> PyTorch chunk
    wih_p = jnp.zeros((LSTM_IN, 4 * HP), jnp.float32)
    whh_p = jnp.zeros((HP, 4 * HP), jnp.float32)
    b_lstm = jnp.zeros((4 * HP,), jnp.float32)
    for d, g in enumerate(gate_src):
        wih_p = wih_p.at[:, d * HP:d * HP + H].set(w_ih[g * H:(g + 1) * H, :].T)
        whh_p = whh_p.at[:H, d * HP:d * HP + H].set(w_hh[g * H:(g + 1) * H, :].T)
        b_lstm = b_lstm.at[d * HP:d * HP + H].set(
            b_ih[g * H:(g + 1) * H] + b_hh[g * H:(g + 1) * H])
    wih_p = wih_p.astype(jnp.bfloat16)
    whh_p = whh_p.astype(jnp.bfloat16)

    wf1_p = jnp.zeros((HP, 128), jnp.float32).at[:H, :].set(w_fc1.T).astype(jnp.bfloat16)
    wf2_p = jnp.zeros((128, 128), jnp.float32).at[:, :NC].set(w_fc2.T).astype(jnp.bfloat16)

    o1, o2, o3, olb, of1, of2, btot = _bias_offsets(64, 128, 128, HP, 128)
    bias_packed = jnp.zeros((1, btot), jnp.float32)
    bias_packed = bias_packed.at[0, o1:o1 + 64].set(b_c1)
    bias_packed = bias_packed.at[0, o2:o2 + 128].set(b_c2)
    bias_packed = bias_packed.at[0, o3:o3 + 128].set(b_c3)
    bias_packed = bias_packed.at[0, olb:olb + 4 * HP].set(b_lstm)
    bias_packed = bias_packed.at[0, of1:of1 + 128].set(b_fc1)
    bias_packed = bias_packed.at[0, of2:of2 + NC].set(b_fc2)

    params = (w1s, w2s, w3s, wih_p, whh_p, wf1_p, wf2_p, bias_packed)

    @jax.jit
    def pallas_forward(x_bcl):
        # Tiny XLA glue: NCL -> NLC, time zero-pad (conv padding=1), channel pad 1 -> 8,
        # im2col the 3 conv1 taps along lanes, and reorder rows to [parity q, time t, batch b]
        # so the kernel only needs static, aligned slices.
        xs = jnp.transpose(x_bcl, (0, 2, 1))                               # (B, SEQ, CIN)
        xs = jnp.pad(xs, ((0, 0), (1, 1), (0, CP1 - xs.shape[2])))         # (B, SEQ+2, CP1)
        taps = jnp.concatenate([xs[:, 0:SEQ], xs[:, 1:SEQ + 1], xs[:, 2:SEQ + 2]],
                               axis=-1)                                    # (B, SEQ, 3*CP1)
        taps = taps.reshape(B, T, 4, 3 * CP1)                              # [b, t, q, :]
        taps = jnp.transpose(taps, (2, 1, 0, 3))                           # [q, t, b, :]
        x1in = taps.reshape(4 * BT, 3 * CP1).astype(jnp.bfloat16)          # row = q*BT + t*B + b
        return cnn_lstm_forward(x1in, params, B, NC)

    # --- pure-JAX reference (logical, unpadded params) ---
    def ref_forward(x_bcl, emulate_bf16_matmul):
        def mm(a, b):
            if emulate_bf16_matmul:   # emulate the kernel's bf16-operand / f32-accumulate matmuls
                a = a.astype(jnp.bfloat16).astype(jnp.float32)
                b = b.astype(jnp.bfloat16).astype(jnp.float32)
            return jnp.matmul(a, b, precision=jax.lax.Precision.HIGHEST)

        xr = jnp.transpose(x_bcl, (0, 2, 1))

        def conv(xin, w, bb):
            L = xin.shape[1]
            xp = jnp.pad(xin, ((0, 0), (1, 1), (0, 0)))
            acc = bb[None, None, :]
            for k in range(3):
                acc = acc + mm(xp[:, k:k + L, :], w[:, :, k].T)
            return acc

        def pool(z):
            Bz, Lz, Cz = z.shape
            return z.reshape(Bz, Lz // 2, 2, Cz).max(axis=2)

        h1 = pool(jax.nn.relu(conv(xr, w_c1, b_c1)))
        h2 = pool(jax.nn.relu(conv(h1, w_c2, b_c2)))
        h3 = jax.nn.relu(conv(h2, w_c3, b_c3))
        hh = jnp.zeros((xr.shape[0], H), jnp.float32)
        cc = jnp.zeros((xr.shape[0], H), jnp.float32)
        for t in range(h3.shape[1]):
            gates = mm(h3[:, t, :], w_ih.T) + mm(hh, w_hh.T) + b_ih + b_hh
            i = jax.nn.sigmoid(gates[:, 0:H])
            f = jax.nn.sigmoid(gates[:, H:2 * H])
            g2 = jnp.tanh(gates[:, 2 * H:3 * H])
            o = jax.nn.sigmoid(gates[:, 3 * H:4 * H])
            cc = f * cc + i * g2
            hh = o * jnp.tanh(cc)
        z = jax.nn.relu(mm(hh, w_fc1.T) + b_fc1)
        return mm(z, w_fc2.T) + b_fc2

    out = jax.block_until_ready(pallas_forward(x))
    assert out.shape == (B, NC), out.shape

    ref_f32 = ref_forward(x, emulate_bf16_matmul=False)   # exact f32 reference
    ref_bf16 = ref_forward(x, emulate_bf16_matmul=True)   # same arithmetic as the kernel's MXU use
    err_f32 = float(jnp.max(jnp.abs(out - ref_f32)))
    err_bf16 = float(jnp.max(jnp.abs(out - ref_bf16)))
    # Kernel matmuls use bf16 operands with f32 accumulation: must match the bf16-emulated
    # reference tightly and the exact-f32 reference loosely.
    assert min(err_f32, err_bf16) < 2e-3, (err_f32, err_bf16)
    assert err_f32 < 5e-2, err_f32
    print("KERNEL_OK")
</pallas_src>

<mosaic_0001>
module attributes {stable_mosaic.version = 11 : i64} {
  func.func @cnn_lstm_kernel(%arg0: memref<32x24xbf16, #tpu.memory_space<vmem>>, %arg1: memref<24x64xbf16, #tpu.memory_space<vmem>>, %arg2: memref<192x128xbf16, #tpu.memory_space<vmem>>, %arg3: memref<384x128xbf16, #tpu.memory_space<vmem>>, %arg4: memref<128x512xbf16, #tpu.memory_space<vmem>>, %arg5: memref<128x512xbf16, #tpu.memory_space<vmem>>, %arg6: memref<128x128xbf16, #tpu.memory_space<vmem>>, %arg7: memref<128x128xbf16, #tpu.memory_space<vmem>>, %arg8: memref<1x1152xf32, #tpu.memory_space<vmem>>, %arg9: memref<2x128xf32, #tpu.memory_space<vmem>>) attributes {dimension_semantics = [], scalar_prefetch = 0 : i64, scratch_operands = 0 : i64, tpu.core_type = #tpu.core_type<tc>} {
    %c0 = arith.constant 0 : index
    %c0_0 = arith.constant 0 : index
    %0 = vector.load %arg8[%c0, %c0_0] : memref<1x1152xf32, #tpu.memory_space<vmem>>, vector<1x64xf32>
    %c0_1 = arith.constant 0 : index
    %c128 = arith.constant 128 : index
    %1 = vector.load %arg8[%c0_1, %c128] : memref<1x1152xf32, #tpu.memory_space<vmem>>, vector<1x128xf32>
    %c0_2 = arith.constant 0 : index
    %c256 = arith.constant 256 : index
    %2 = vector.load %arg8[%c0_2, %c256] : memref<1x1152xf32, #tpu.memory_space<vmem>>, vector<1x128xf32>
    %c0_3 = arith.constant 0 : index
    %c384 = arith.constant 384 : index
    %3 = vector.load %arg8[%c0_3, %c384] : memref<1x1152xf32, #tpu.memory_space<vmem>>, vector<1x512xf32>
    %c0_4 = arith.constant 0 : index
    %c896 = arith.constant 896 : index
    %4 = vector.load %arg8[%c0_4, %c896] : memref<1x1152xf32, #tpu.memory_space<vmem>>, vector<1x128xf32>
    %c0_5 = arith.constant 0 : index
    %c1024 = arith.constant 1024 : index
    %5 = vector.load %arg8[%c0_5, %c1024] : memref<1x1152xf32, #tpu.memory_space<vmem>>, vector<1x128xf32>
    %c0_6 = arith.constant 0 : index
    %c0_7 = arith.constant 0 : index
    %6 = vector.load %arg0[%c0_6, %c0_7] : memref<32x24xbf16, #tpu.memory_space<vmem>>, vector<32x24xbf16>
    %c0_8 = arith.constant 0 : index
    %c0_9 = arith.constant 0 : index
    %7 = vector.load %arg1[%c0_8, %c0_9] : memref<24x64xbf16, #tpu.memory_space<vmem>>, vector<24x64xbf16>
    %cst = arith.constant dense<0.000000e+00> : vector<32x64xf32>
    %8 = tpu.matmul %6, %7, %cst {dimension_numbers = #tpu.dot_dimension_numbers<[1], [0], [0], [1], [0, 0, 1, 1], [], []>} : vector<32x24xbf16>, vector<24x64xbf16>, vector<32x64xf32> -> vector<32x64xf32>
    %9 = vector.extract_strided_slice %8 {offsets = [0, 0], sizes = [8, 64], strides = [1, 1]} : vector<32x64xf32> to vector<8x64xf32>
    %10 = vector.extract_strided_slice %8 {offsets = [8, 0], sizes = [8, 64], strides = [1, 1]} : vector<32x64xf32> to vector<8x64xf32>
    %11 = vector.extract_strided_slice %8 {offsets = [16, 0], sizes = [8, 64], strides = [1, 1]} : vector<32x64xf32> to vector<8x64xf32>
    %12 = vector.extract_strided_slice %8 {offsets = [24, 0], sizes = [8, 64], strides = [1, 1]} : vector<32x64xf32> to vector<8x64xf32>
    %13 = arith.maximumf %9, %10 : vector<8x64xf32>
    %14 = vector.broadcast %0 : vector<1x64xf32> to vector<8x64xf32>
    %15 = arith.addf %13, %14 : vector<8x64xf32>
    %cst_10 = arith.constant 0.000000e+00 : f32
    %16 = vector.broadcast %cst_10 : f32 to vector<8x64xf32>
    %17 = arith.maximumf %15, %16 : vector<8x64xf32>
    %18 = arith.maximumf %11, %12 : vector<8x64xf32>
    %19 = vector.broadcast %0 : vector<1x64xf32> to vector<8x64xf32>
    %20 = arith.addf %18, %19 : vector<8x64xf32>
    %cst_11 = arith.constant 0.000000e+00 : f32
    %21 = vector.broadcast %cst_11 : f32 to vector<8x64xf32>
    %22 = arith.maximumf %20, %21 : vector<8x64xf32>
    %cst_12 = arith.constant 0.000000e+00 : f32
    %23 = vector.broadcast %cst_12 : f32 to vector<2x64xf32>
    %24 = vector.extract_strided_slice %22 {offsets = [0, 0], sizes = [6, 64], strides = [1, 1]} : vector<8x64xf32> to vector<6x64xf32>
    %25 = tpu.concatenate %23, %24 in 0 : vector<2x64xf32>, vector<6x64xf32> -> vector<8x64xf32>
    %26 = tpu.concatenate %25, %17, %22 in 1 : vector<8x64xf32>, vector<8x64xf32>, vector<8x64xf32> -> vector<8x192xf32>
    %cst_13 = arith.constant 0.000000e+00 : f32
    %27 = vector.broadcast %cst_13 : f32 to vector<2x64xf32>
    %28 = vector.extract_strided_slice %17 {offsets = [2, 0], sizes = [6, 64], strides = [1, 1]} : vector<8x64xf32> to vector<6x64xf32>
    %29 = tpu.concatenate %28, %27 in 0 : vector<6x64xf32>, vector<2x64xf32> -> vector<8x64xf32>
    %30 = tpu.concatenate %17, %22, %29 in 1 : vector<8x64xf32>, vector<8x64xf32>, vector<8x64xf32> -> vector<8x192xf32>
    %31 = tpu.concatenate %26, %30 in 0 : vector<8x192xf32>, vector<8x192xf32> -> vector<16x192xf32>
    %c0_14 = arith.constant 0 : index
    %c0_15 = arith.constant 0 : index
    %32 = vector.load %arg2[%c0_14, %c0_15] : memref<192x128xbf16, #tpu.memory_space<vmem>>, vector<192x128xbf16>
    %33 = arith.truncf %31 : vector<16x192xf32> to vector<16x192xbf16>
    %cst_16 = arith.constant dense<0.000000e+00> : vector<16x128xf32>
    %34 = tpu.matmul %33, %32, %cst_16 {dimension_numbers = #tpu.dot_dimension_numbers<[1], [0], [0], [1], [0, 0, 1, 1], [], []>} : vector<16x192xbf16>, vector<192x128xbf16>, vector<16x128xf32> -> vector<16x128xf32>
    %35 = vector.extract_strided_slice %34 {offsets = [0, 0], sizes = [8, 128], strides = [1, 1]} : vector<16x128xf32> to vector<8x128xf32>
    %36 = vector.extract_strided_slice %34 {offsets = [8, 0], sizes = [8, 128], strides = [1, 1]} : vector<16x128xf32> to vector<8x128xf32>
    %37 = arith.maximumf %35, %36 : vector<8x128xf32>
    %38 = vector.broadcast %1 : vector<1x128xf32> to vector<8x128xf32>
    %39 = arith.addf %37, %38 : vector<8x128xf32>
    %cst_17 = arith.constant 0.000000e+00 : f32
    %40 = vector.broadcast %cst_17 : f32 to vector<8x128xf32>
    %41 = arith.maximumf %39, %40 : vector<8x128xf32>
    %cst_18 = arith.constant 0.000000e+00 : f32
    %42 = vector.broadcast %cst_18 : f32 to vector<2x128xf32>
    %43 = vector.extract_strided_slice %41 {offsets = [0, 0], sizes = [6, 128], strides = [1, 1]} : vector<8x128xf32> to vector<6x128xf32>
    %44 = tpu.concatenate %42, %43 in 0 : vector<2x128xf32>, vector<6x128xf32> -> vector<8x128xf32>
    %cst_19 = arith.constant 0.000000e+00 : f32
    %45 = vector.broadcast %cst_19 : f32 to vector<2x128xf32>
    %46 = vector.extract_strided_slice %41 {offsets = [2, 0], sizes = [6, 128], strides = [1, 1]} : vector<8x128xf32> to vector<6x128xf32>
    %47 = tpu.concatenate %46, %45 in 0 : vector<6x128xf32>, vector<2x128xf32> -> vector<8x128xf32>
    %48 = tpu.concatenate %44, %41, %47 in 1 : vector<8x128xf32>, vector<8x128xf32>, vector<8x128xf32> -> vector<8x384xf32>
    %c0_20 = arith.constant 0 : index
    %c0_21 = arith.constant 0 : index
    %49 = vector.load %arg3[%c0_20, %c0_21] : memref<384x128xbf16, #tpu.memory_space<vmem>>, vector<384x128xbf16>
    %50 = arith.truncf %48 : vector<8x384xf32> to vector<8x384xbf16>
    %cst_22 = arith.constant dense<0.000000e+00> : vector<8x128xf32>
    %51 = tpu.matmul %50, %49, %cst_22 {dimension_numbers = #tpu.dot_dimension_numbers<[1], [0], [0], [1], [0, 0, 1, 1], [], []>} : vector<8x384xbf16>, vector<384x128xbf16>, vector<8x128xf32> -> vector<8x128xf32>
    %52 = vector.broadcast %2 : vector<1x128xf32> to vector<8x128xf32>
    %53 = arith.addf %51, %52 : vector<8x128xf32>
    %cst_23 = arith.constant 0.000000e+00 : f32
    %54 = vector.broadcast %cst_23 : f32 to vector<8x128xf32>
    %55 = arith.maximumf %53, %54 : vector<8x128xf32>
    %c0_24 = arith.constant 0 : index
    %c0_25 = arith.constant 0 : index
    %56 = vector.load %arg4[%c0_24, %c0_25] : memref<128x512xbf16, #tpu.memory_space<vmem>>, vector<128x512xbf16>
    %57 = arith.truncf %55 : vector<8x128xf32> to vector<8x128xbf16>
    %cst_26 = arith.constant dense<0.000000e+00> : vector<8x512xf32>
    %58 = tpu.matmul %57, %56, %cst_26 {dimension_numbers = #tpu.dot_dimension_numbers<[1], [0], [0], [1], [0, 0, 1, 1], [], []>} : vector<8x128xbf16>, vector<128x512xbf16>, vector<8x512xf32> -> vector<8x512xf32>
    %59 = vector.broadcast %3 : vector<1x512xf32> to vector<8x512xf32>
    %60 = arith.addf %58, %59 : vector<8x512xf32>
    %c0_27 = arith.constant 0 : index
    %c0_28 = arith.constant 0 : index
    %61 = vector.load %arg5[%c0_27, %c0_28] : memref<128x512xbf16, #tpu.memory_space<vmem>>, vector<128x512xbf16>
    %cst_29 = arith.constant 0.000000e+00 : f32
    %62 = vector.broadcast %cst_29 : f32 to vector<2x128xf32>
    %cst_30 = arith.constant 0.000000e+00 : f32
    %63 = vector.broadcast %cst_30 : f32 to vector<2x128xf32>
    %64 = vector.extract_strided_slice %60 {offsets = [0, 0], sizes = [2, 512], strides = [1, 1]} : vector<8x512xf32> to vector<2x512xf32>
    %65 = arith.truncf %62 : vector<2x128xf32> to vector<2x128xbf16>
    %cst_31 = arith.constant dense<0.000000e+00> : vector<2x512xf32>
    %66 = tpu.matmul %65, %61, %cst_31 {dimension_numbers = #tpu.dot_dimension_numbers<[1], [0], [0], [1], [0, 0, 1, 1], [], []>} : vector<2x128xbf16>, vector<128x512xbf16>, vector<2x512xf32> -> vector<2x512xf32>
    %67 = arith.addf %64, %66 : vector<2x512xf32>
    %68 = vector.extract_strided_slice %67 {offsets = [0, 0], sizes = [2, 384], strides = [1, 1]} : vector<2x512xf32> to vector<2x384xf32>
    %69 = arith.negf %68 : vector<2x384xf32>
    %70 = math.exp %69 : vector<2x384xf32>
    %cst_32 = arith.constant 1.000000e+00 : f32
    %71 = vector.broadcast %cst_32 : f32 to vector<2x384xf32>
    %72 = arith.addf %71, %70 : vector<2x384xf32>
    %73 = arith.divf %71, %72 : vector<2x384xf32>
    %74 = vector.extract_strided_slice %73 {offsets = [0, 0], sizes = [2, 128], strides = [1, 1]} : vector<2x384xf32> to vector<2x128xf32>
    %75 = vector.extract_strided_slice %73 {offsets = [0, 128], sizes = [2, 128], strides = [1, 1]} : vector<2x384xf32> to vector<2x128xf32>
    %76 = vector.extract_strided_slice %73 {offsets = [0, 256], sizes = [2, 128], strides = [1, 1]} : vector<2x384xf32> to vector<2x128xf32>
    %77 = vector.extract_strided_slice %67 {offsets = [0, 384], sizes = [2, 128], strides = [1, 1]} : vector<2x512xf32> to vector<2x128xf32>
    %78 = math.tanh %77 : vector<2x128xf32>
    %79 = arith.mulf %75, %63 : vector<2x128xf32>
    %80 = arith.mulf %74, %78 : vector<2x128xf32>
    %81 = arith.addf %79, %80 : vector<2x128xf32>
    %82 = math.tanh %81 : vector<2x128xf32>
    %83 = arith.mulf %76, %82 : vector<2x128xf32>
    %84 = vector.extract_strided_slice %60 {offsets = [2, 0], sizes = [2, 512], strides = [1, 1]} : vector<8x512xf32> to vector<2x512xf32>
    %85 = arith.truncf %83 : vector<2x128xf32> to vector<2x128xbf16>
    %cst_33 = arith.constant dense<0.000000e+00> : vector<2x512xf32>
    %86 = tpu.matmul %85, %61, %cst_33 {dimension_numbers = #tpu.dot_dimension_numbers<[1], [0], [0], [1], [0, 0, 1, 1], [], []>} : vector<2x128xbf16>, vector<128x512xbf16>, vector<2x512xf32> -> vector<2x512xf32>
    %87 = arith.addf %84, %86 : vector<2x512xf32>
    %88 = vector.extract_strided_slice %87 {offsets = [0, 0], sizes = [2, 384], strides = [1, 1]} : vector<2x512xf32> to vector<2x384xf32>
    %89 = arith.negf %88 : vector<2x384xf32>
    %90 = math.exp %89 : vector<2x384xf32>
    %cst_34 = arith.constant 1.000000e+00 : f32
    %91 = vector.broadcast %cst_34 : f32 to vector<2x384xf32>
    %92 = arith.addf %91, %90 : vector<2x384xf32>
    %93 = arith.divf %91, %92 : vector<2x384xf32>
    %94 = vector.extract_strided_slice %93 {offsets = [0, 0], sizes = [2, 128], strides = [1, 1]} : vector<2x384xf32> to vector<2x128xf32>
    %95 = vector.extract_strided_slice %93 {offsets = [0, 128], sizes = [2, 128], strides = [1, 1]} : vector<2x384xf32> to vector<2x128xf32>
    %96 = vector.extract_strided_slice %93 {offsets = [0, 256], sizes = [2, 128], strides = [1, 1]} : vector<2x384xf32> to vector<2x128xf32>
    %97 = vector.extract_strided_slice %87 {offsets = [0, 384], sizes = [2, 128], strides = [1, 1]} : vector<2x512xf32> to vector<2x128xf32>
    %98 = math.tanh %97 : vector<2x128xf32>
    %99 = arith.mulf %95, %81 : vector<2x128xf32>
    %100 = arith.mulf %94, %98 : vector<2x128xf32>
    %101 = arith.addf %99, %100 : vector<2x128xf32>
    %102 = math.tanh %101 : vector<2x128xf32>
    %103 = arith.mulf %96, %102 : vector<2x128xf32>
    %104 = vector.extract_strided_slice %60 {offsets = [4, 0], sizes = [2, 512], strides = [1, 1]} : vector<8x512xf32> to vector<2x512xf32>
    %105 = arith.truncf %103 : vector<2x128xf32> to vector<2x128xbf16>
    %cst_35 = arith.constant dense<0.000000e+00> : vector<2x512xf32>
    %106 = tpu.matmul %105, %61, %cst_35 {dimension_numbers = #tpu.dot_dimension_numbers<[1], [0], [0], [1], [0, 0, 1, 1], [], []>} : vector<2x128xbf16>, vector<128x512xbf16>, vector<2x512xf32> -> vector<2x512xf32>
    %107 = arith.addf %104, %106 : vector<2x512xf32>
    %108 = vector.extract_strided_slice %107 {offsets = [0, 0], sizes = [2, 384], strides = [1, 1]} : vector<2x512xf32> to vector<2x384xf32>
    %109 = arith.negf %108 : vector<2x384xf32>
    %110 = math.exp %109 : vector<2x384xf32>
    %cst_36 = arith.constant 1.000000e+00 : f32
    %111 = vector.broadcast %cst_36 : f32 to vector<2x384xf32>
    %112 = arith.addf %111, %110 : vector<2x384xf32>
    %113 = arith.divf %111, %112 : vector<2x384xf32>
    %114 = vector.extract_strided_slice %113 {offsets = [0, 0], sizes = [2, 128], strides = [1, 1]} : vector<2x384xf32> to vector<2x128xf32>
    %115 = vector.extract_strided_slice %113 {offsets = [0, 128], sizes = [2, 128], strides = [1, 1]} : vector<2x384xf32> to vector<2x128xf32>
    %116 = vector.extract_strided_slice %113 {offsets = [0, 256], sizes = [2, 128], strides = [1, 1]} : vector<2x384xf32> to vector<2x128xf32>
    %117 = vector.extract_strided_slice %107 {offsets = [0, 384], sizes = [2, 128], strides = [1, 1]} : vector<2x512xf32> to vector<2x128xf32>
    %118 = math.tanh %117 : vector<2x128xf32>
    %119 = arith.mulf %115, %101 : vector<2x128xf32>
    %120 = arith.mulf %114, %118 : vector<2x128xf32>
    %121 = arith.addf %119, %120 : vector<2x128xf32>
    %122 = math.tanh %121 : vector<2x128xf32>
    %123 = arith.mulf %116, %122 : vector<2x128xf32>
    %124 = vector.extract_strided_slice %60 {offsets = [6, 0], sizes = [2, 512], strides = [1, 1]} : vector<8x512xf32> to vector<2x512xf32>
    %125 = arith.truncf %123 : vector<2x128xf32> to vector<2x128xbf16>
    %cst_37 = arith.constant dense<0.000000e+00> : vector<2x512xf32>
    %126 = tpu.matmul %125, %61, %cst_37 {dimension_numbers = #tpu.dot_dimension_numbers<[1], [0], [0], [1], [0, 0, 1, 1], [], []>} : vector<2x128xbf16>, vector<128x512xbf16>, vector<2x512xf32> -> vector<2x512xf32>
    %127 = arith.addf %124, %126 : vector<2x512xf32>
    %128 = vector.extract_strided_slice %127 {offsets = [0, 0], sizes = [2, 384], strides = [1, 1]} : vector<2x512xf32> to vector<2x384xf32>
    %129 = arith.negf %128 : vector<2x384xf32>
    %130 = math.exp %129 : vector<2x384xf32>
    %cst_38 = arith.constant 1.000000e+00 : f32
    %131 = vector.broadcast %cst_38 : f32 to vector<2x384xf32>
    %132 = arith.addf %131, %130 : vector<2x384xf32>
    %133 = arith.divf %131, %132 : vector<2x384xf32>
    %134 = vector.extract_strided_slice %133 {offsets = [0, 0], sizes = [2, 128], strides = [1, 1]} : vector<2x384xf32> to vector<2x128xf32>
    %135 = vector.extract_strided_slice %133 {offsets = [0, 128], sizes = [2, 128], strides = [1, 1]} : vector<2x384xf32> to vector<2x128xf32>
    %136 = vector.extract_strided_slice %133 {offsets = [0, 256], sizes = [2, 128], strides = [1, 1]} : vector<2x384xf32> to vector<2x128xf32>
    %137 = vector.extract_strided_slice %127 {offsets = [0, 384], sizes = [2, 128], strides = [1, 1]} : vector<2x512xf32> to vector<2x128xf32>
    %138 = math.tanh %137 : vector<2x128xf32>
    %139 = arith.mulf %135, %121 : vector<2x128xf32>
    %140 = arith.mulf %134, %138 : vector<2x128xf32>
    %141 = arith.addf %139, %140 : vector<2x128xf32>
    %142 = math.tanh %141 : vector<2x128xf32>
    %143 = arith.mulf %136, %142 : vector<2x128xf32>
    %c0_39 = arith.constant 0 : index
    %c0_40 = arith.constant 0 : index
    %144 = vector.load %arg6[%c0_39, %c0_40] : memref<128x128xbf16, #tpu.memory_space<vmem>>, vector<128x128xbf16>
    %145 = arith.truncf %143 : vector<2x128xf32> to vector<2x128xbf16>
    %cst_41 = arith.constant dense<0.000000e+00> : vector<2x128xf32>
    %146 = tpu.matmul %145, %144, %cst_41 {dimension_numbers = #tpu.dot_dimension_numbers<[1], [0], [0], [1], [0, 0, 1, 1], [], []>} : vector<2x128xbf16>, vector<128x128xbf16>, vector<2x128xf32> -> vector<2x128xf32>
    %147 = vector.broadcast %4 : vector<1x128xf32> to vector<2x128xf32>
    %148 = arith.addf %146, %147 : vector<2x128xf32>
    %cst_42 = arith.constant 0.000000e+00 : f32
    %149 = vector.broadcast %cst_42 : f32 to vector<2x128xf32>
    %150 = arith.maximumf %148, %149 : vector<2x128xf32>
    %c0_43 = arith.constant 0 : index
    %c0_44 = arith.constant 0 : index
    %151 = vector.load %arg7[%c0_43, %c0_44] : memref<128x128xbf16, #tpu.memory_space<vmem>>, vector<128x128xbf16>
    %152 = arith.truncf %150 : vector<2x128xf32> to vector<2x128xbf16>
    %cst_45 = arith.constant dense<0.000000e+00> : vector<2x128xf32>
    %153 = tpu.matmul %152, %151, %cst_45 {dimension_numbers = #tpu.dot_dimension_numbers<[1], [0], [0], [1], [0, 0, 1, 1], [], []>} : vector<2x128xbf16>, vector<128x128xbf16>, vector<2x128xf32> -> vector<2x128xf32>
    %154 = vector.broadcast %5 : vector<1x128xf32> to vector<2x128xf32>
    %155 = arith.addf %153, %154 : vector<2x128xf32>
    %c0_46 = arith.constant 0 : index
    %c0_47 = arith.constant 0 : index
    %156 = vector.load %arg9[%c0_46, %c0_47] : memref<2x128xf32, #tpu.memory_space<vmem>>, vector<2x128xf32>
    tpu.vector_store %arg9[%c0_46, %c0_47], %155 {strides = array<i32>} : memref<2x128xf32, #tpu.memory_space<vmem>>, vector<2x128xf32>,
    return
  }
}

</mosaic_0001>

<bundles_post_ra>
// kernel: pallas_forward.1
= control target key start
LH: loop header
LB: loop body
LE: loop exit
PB: predicated region body
PF: predicated region fallthrough
CT: control target
= control target key end

     0   :  { %14 = vsyncpa [#allocation3], 0  ;;  %s3045_s0 = inlined_call_operand.vmem [shape: bf16[32,24], index: 0, kind: input, shape index: {}]   ;;  %s3046_s1 = inlined_call_operand.hbm [shape: bf16[24,64], index: 1, kind: input, shape index: {}]   ;;  %s3047_s2 = inlined_call_operand.hbm [shape: bf16[192,128], index: 2, kind: input, shape index: {}]   ;;  %s3048_s3 = inlined_call_operand.vmem [shape: bf16[384,128], index: 3, kind: input, shape index: {}]   ;;  %s3049_s4 = inlined_call_operand.hbm [shape: bf16[128,512], index: 4, kind: input, shape index: {}]   ;;  %s3050_s5 = inlined_call_operand.hbm [shape: bf16[128,512], index: 5, kind: input, shape index: {}]   ;;  %s3051_s6 = inlined_call_operand.hbm [shape: bf16[128,128], index: 6, kind: input, shape index: {}]   ;;  %s3052_s7 = inlined_call_operand.hbm [shape: bf16[128,128], index: 7, kind: input, shape index: {}]   ;;  %s3053_s8 = inlined_call_operand.vmem [shape: f32[1,1152], index: 8, kind: input, shape index: {}]   ;;  %s3054_s9 = inlined_call_operand.hbm [shape: f32[2,128], index: 9, kind: output, shape index: {}]  }
   0x1   :  { %15 = vsyncpa [#allocation6], 0 }
   0x2   :  { %16 = vsyncpa [#allocation9], 0 }
   0x3   :  { %17 = vsyncpa [#allocation12], 0 }
   0x4   :  { %18 = vsyncpa [#allocation4], 0  ;;  %s2561_s30 = smov [#allocation5]  }
   0x5   :  { %s38_s10 = sshll.u32 %s2561_s30, 4  ;;  %s39_s10 = int_to_ptr.vmem [resolvable:$true] %s38_s10 }
   0x6   :  { %s2419_s11 = scalar_lea.vmem %s39_s10, 1536  ;;  %p2424_p1 = scmp.lt.s32.totalorder %s39_s10, %s39_s10 }
   0x7   :  { %p2420_p0 = scmp.ne.s32.totalorder %s39_s10, %s2419_s11  ;;  %p2425_p2 = scmp.lt.s32.totalorder %s2419_s11, %s2419_s11 }
   0x9   :  { %p2426_p3 = por %p2425_p2, %p2424_p1 }
   0xb   :  { %p2427_p4 = pnand %p2426_p3, %p2420_p0 }
   0xd   :  { %2430 = shalt.err (!%p2427_p4)
}
   0xe   :  { %s2562_s12 = smov 64   ;;  %s2563_s13 = smov 4  }
   0xf   :  { %44 = dma.hbm_to_vmem [thread:$0]  %s3047_s2, 1536, %s39_s10, [#allocation6], %s2562_s12, %s2562_s12, %s2563_s13  }
  0x10   :  { %s2564_s16 = smov [#allocation8]   ;;  %s2565_s18 = smov [#allocation2]  }
  0x11   :  { %s64_s17 = sshll.u32 %s2564_s16, 4  ;;  %s26_s19 = sshll.u32 %s2565_s18, 4  ;;  %s65_s17 = int_to_ptr.vmem [resolvable:$true] %s64_s17  ;;  %s27_s19 = int_to_ptr.vmem [resolvable:$true] %s26_s19 }
  0x12   :  { %s2439_s20 = scalar_lea.vmem %s65_s17, 4096  ;;  %p2444_p6 = scmp.lt.s32.totalorder %s65_s17, %s65_s17 }
  0x13   :  { %p2440_p5 = scmp.ne.s32.totalorder %s65_s17, %s2439_s20  ;;  %p2445_p7 = scmp.lt.s32.totalorder %s2439_s20, %s2439_s20 }
  0x15   :  { %p2446_p8 = por %p2445_p7, %p2444_p6 }
  0x17   :  { %p2447_p9 = pnand %p2446_p8, %p2440_p5 }
  0x19   :  { %2450 = shalt.err (!%p2447_p9)
}
  0x1a   :  { %s2566_s21 = smov 256   ;;  %s2567_s22 = smov 16  }
  0x1b   :  { %70 = dma.hbm_to_vmem [thread:$0]  %s3050_s5, 4096, %s65_s17, [#allocation9], %s2566_s21, %s2566_s21, %s2567_s22  }
  0x1c   :  { %s2459_s2 = scalar_lea.vmem %s27_s19, 192  ;;  %p2464_p11 = scmp.lt.s32.totalorder %s27_s19, %s27_s19 }
  0x1d   :  { %p2460_p10 = scmp.ne.s32.totalorder %s27_s19, %s2459_s2  ;;  %p2465_p12 = scmp.lt.s32.totalorder %s2459_s2, %s2459_s2 }
  0x1f   :  { %p2466_p13 = por %p2465_p12, %p2464_p11 }
  0x21   :  { %p2467_p0 = pnand %p2466_p13, %p2460_p10 }
  0x23   :  { %2470 = shalt.err (!%p2467_p0)
}
  0x24   :  { %32 = dma.hbm_to_vmem [thread:$0]  %s3046_s1, 192, %s27_s19, [#allocation3], %s2562_s12, %s2562_s12, %s2563_s13  }
  0x25   :  { %s2568_s27 = smov [#allocation7]   ;;  %s2569_s29 = smov [#allocation10]  }
  0x26   :  { %s52_s28 = sshll.u32 %s2568_s27, 4  ;;  %s76_s5 = sshll.u32 %s2569_s29, 4  ;;  %s53_s28 = int_to_ptr.vmem [resolvable:$true] %s52_s28  ;;  %s77_s5 = int_to_ptr.vmem [resolvable:$true] %s76_s5 }
  0x27   :  { %s2479_s30 = scalar_lea.vmem %s53_s28, 4096  ;;  %p2484_p2 = scmp.lt.s32.totalorder %s53_s28, %s53_s28 }
  0x28   :  { %p2480_p1 = scmp.ne.s32.totalorder %s53_s28, %s2479_s30  ;;  %p2485_p3 = scmp.lt.s32.totalorder %s2479_s30, %s2479_s30 }
  0x2a   :  { %p2486_p4 = por %p2485_p3, %p2484_p2 }
  0x2c   :  { %p2487_p5 = pnand %p2486_p4, %p2480_p1 }
  0x2e   :  { %2490 = shalt.err (!%p2487_p5)
}
  0x2f   :  { %58 = dma.hbm_to_vmem [thread:$0]  %s3049_s4, 4096, %s53_s28, [#allocation6], %s2566_s21, %s2566_s21, %s2567_s22  }
  0x30   :  { %s2499_s14 = scalar_lea.vmem %s77_s5, 1024  ;;  %p2504_p7 = scmp.lt.s32.totalorder %s77_s5, %s77_s5 }
  0x31   :  { %p2500_p6 = scmp.ne.s32.totalorder %s77_s5, %s2499_s14  ;;  %p2505_p8 = scmp.lt.s32.totalorder %s2499_s14, %s2499_s14 }
  0x33   :  { %p2506_p9 = por %p2505_p8, %p2504_p7 }
  0x35   :  { %p2507_p10 = pnand %p2506_p9, %p2500_p6 }
  0x37   :  { %2510 = shalt.err (!%p2507_p10)
}
  0x38   :  { %82 = dma.hbm_to_vmem [thread:$0]  %s3051_s6, 1024, %s77_s5, [#allocation9], %s2562_s12, %s2562_s12, %s2563_s13  }
  0x39   :  { %s2570_s16 = smov [#allocation11]  }
  0x3a   :  { %s88_s17 = sshll.u32 %s2570_s16, 4  ;;  %s89_s17 = int_to_ptr.vmem [resolvable:$true] %s88_s17 }
  0x3b   :  { %s2519_s18 = scalar_lea.vmem %s89_s17, 1024  ;;  %p2524_p12 = scmp.lt.s32.totalorder %s89_s17, %s89_s17 }
  0x3c   :  { %p2520_p11 = scmp.ne.s32.totalorder %s89_s17, %s2519_s18  ;;  %p2525_p13 = scmp.lt.s32.totalorder %s2519_s18, %s2519_s18 }
  0x3e   :  { %p2526_p0 = por %p2525_p13, %p2524_p12 }
  0x40   :  { %p2527_p1 = pnand %p2526_p0, %p2520_p11 }
  0x42   :  { %2530 = shalt.err (!%p2527_p1)
}
  0x43   :  { %94 = dma.hbm_to_vmem [thread:$0]  %s3052_s7, 1024, %s89_s17, [#allocation12], %s2562_s12, %s2562_s12, %s2563_s13  }
  0x44   :  { %2551 = dma.done.wait [#allocation3], 192  }
  0x45   :  { %2552 = vsyncadd [#allocation3], 4294967104 }
  0x46   :  { %2553 = dma.done.wait [#allocation6], 5632  }
  0x47   :  { %2554 = vsyncadd [#allocation6], 4294961664 }
  0x48   :  { %2555 = dma.done.wait [#allocation9], 5120  }
  0x49   :  { %2556 = vsyncadd [#allocation9], 4294962176 }
  0x4a   :  { %2557 = dma.done.wait [#allocation12], 1024  }
  0x4b   :  { %2558 = vsyncadd [#allocation12], 4294966272  ;;  %vm155_vm0 = vcmask 1043456   ;;  %v2195_v0 = vld [vmem:[#allocation2 + $0x8] ss:$0 sps:$4 sm:$0xff]   ;;  %v2196_v1 = vld [vmem:[#allocation2] sm:$0xff]  }
  0x4c   :  { %vm148_vm1 = vcmask 195584   ;;  %2175 = vmatprep.subr.msk.bf16.mxu1 %vm155_vm0, %v2195_v0  ;;  %v157_v2 = vsel %vm155_vm0, %v2195_v0, 0  ;;  %v2197_v3 = vld [vmem:[%s3045_s0] sm:$0xff]   ;;  %v2198_v4 = vld [vmem:[%s3045_s0 + $0x8] sm:$0xff]   ;;  %v2571_v6 = vmov 0   ;;  %v2201_v8 = vld [vmem:[#allocation5 + $0x28] sm:$0xff]  }
  0x4d   :  { %2108 = vmatpush3.bf16.msra.mxu1 %v157_v2  ;;  %2111 = vmatprep.mubr.msk.bf16.mxu1 %vm148_vm1, %v2197_v3  ;;  %v2199_v5 = vld [vmem:[#allocation5 + $0x38] sm:$0xff]   ;;  %v2200_v7 = vld [vmem:[#allocation5 + $0x30] sm:$0xff]   ;;  %v2202_v9 = vld [vmem:[#allocation5 + $0x20] sm:$0xff]   ;;  %vm233_vm2 = vcmask 1045504   ;;  %vm229_vm3 = vcmask 523264   ;;  %vm223_vm4 = vcmask 1041408  }
  0x4e   :  { %2109 = vmatprep.subr.bf16.mxu1 %v2196_v1  ;;  %v2203_v10 = vld [vmem:[#allocation5 + $0x18] sm:$0xff]   ;;  %v2204_v11 = vld [vmem:[#allocation5 + $0x10] sm:$0xff]   ;;  %v2205_v12 = vld [vmem:[#allocation5 + $0x8] sm:$0xff]   ;;  %v2572_v57 = vmov 0.0   ;;  %vm2573_vm7 = vmmov 0   ;;  %s2574_s23 = smov [#allocation13]  }
  0x4f   :  { %v2206_v13 = vld [vmem:[#allocation5] sm:$0xff]   ;;  %v2207_v14 = vld [vmem:[#allocation5 + $0x58] sm:$0xff]   ;;  %v2208_v15 = vld [vmem:[#allocation5 + $0x50] sm:$0xff]   ;;  %s1894_s24 = sshll.u32 %s2574_s23, 4  ;;  %s1895_s24 = int_to_ptr.vmem [resolvable:$true] %s1894_s24 }
  0x50   :  { %v2209_v16 = vld [vmem:[#allocation5 + $0x48] sm:$0xff]   ;;  %v2210_v19 = vld [vmem:[#allocation5 + $0x40] sm:$0xff]   ;;  %v1912_v20 = vld [vmem:[%s3053_s8] ss:$0 sm:$0xff]  ;;  %s2531_s2 = scalar_lea.vmem %s1895_s24, 32  ;;  %p2536_p3 = scmp.lt.s32.totalorder %s1895_s24, %s1895_s24 }
  0x51   :  { %2110 = vmatpush3.bf16.msra.mxu1 %v2196_v1  ;;  %v2211_v26 = vld [vmem:[%s3048_s3 + $0x78] sm:$0xff]   ;;  %v2213_v28 = vld [vmem:[%s3048_s3 + $0x70] sm:$0xff]   ;;  %v2215_v33 = vld [vmem:[%s3048_s3 + $0x68] sm:$0xff]   ;;  %p2532_p2 = scmp.ne.s32.totalorder %s1895_s24, %s2531_s2  ;;  %p2537_p4 = scmp.lt.s32.totalorder %s2531_s2, %s2531_s2 }
  0x52   :  { %340 = vmatprep.subr.bf16.mxu1 %v2571_v6  ;;  %v2212_v27 = vld [vmem:[%s3048_s3 + $0x38] sm:$0xff]   ;;  %2058 = vmatprep.subr.bf16.mxu0 %v2211_v26  ;;  %v2214_v30 = vld [vmem:[%s3048_s3 + $0x30] sm:$0xff]   ;;  %v2216_v36 = vld [vmem:[%s3048_s3 + $0x28] sm:$0xff]  }
  0x53   :  { %2059 = vmatpush3.bf16.msra.mxu0 %v2212_v27  ;;  %v2217_v38 = vld [vmem:[%s3048_s3 + $0x60] sm:$0xff]   ;;  %v2219_v41 = vld [vmem:[%s3048_s3 + $0x58] sm:$0xff]   ;;  %v2221_v51 = vld [vmem:[%s3048_s3 + $0x50] sm:$0xff]   ;;  %p2538_p5 = por %p2537_p4, %p2536_p3 }
  0x54   :  { %2112 = vmatmul.mubr.msk.bf16.vlgmr.msra.gmra.mxu1 %vm148_vm1, %v2198_v4  ;;  %2060 = vmatprep.subr.bf16.mxu0 %v2213_v28  ;;  %v2218_v40 = vld [vmem:[%s3048_s3 + $0x20] sm:$0xff]   ;;  %v2220_v42 = vld [vmem:[%s3048_s3 + $0x18] sm:$0xff]   ;;  %v2222_v52 = vld [vmem:[%s3048_s3 + $0x10] sm:$0xff]  }
  0x55   :  { %341 = vmatpush1.bf16.msra.mxu1 %v2199_v5  ;;  %v2223_v53 = vld [vmem:[%s3048_s3 + $0x48] sm:$0xff]   ;;  %v2225_v55 = vld [vmem:[%s3048_s3 + $0x40] sm:$0xff]   ;;  %vm1952_vm5 = vmneg %vm223_vm4  ;;  %p2539_p6 = pnand %p2538_p5, %p2532_p2 }
  0x56   :  { %342 = vmatprep.subr.bf16.mxu1 %v2571_v6  ;;  %v2224_v54 = vld [vmem:[%s3048_s3 + $0x8] sm:$0xff]   ;;  %v2226_v56 = vld [vmem:[%s3048_s3] sm:$0xff]   ;;  %vm1954_vm6 = vmpackc.low %vm1952_vm5, %vm1952_vm5 }
  0x57   :  { %2061 = vmatpush3.bf16.msra.mxu0 %v2214_v30  ;;  %v1926_v60 = vld [vmem:[%s3053_s8 + $0x1] ss:$0 sm:$0xff]  ;;  %v2227_v4 = vld [vmem:[%s3048_s3 + $0xb8] sm:$0xff]   ;;  %vm1957_vm8 = vmpackc.low %vm233_vm2, %vm233_vm2 }
  0x58   :  { %2062 = vmatprep.subr.bf16.mxu0 %v2215_v33  ;;  %v2247_v26 = vld [vmem:[#allocation7 + $0xa0] ss:$16 sps:$4 sm:$0xff]   ;;  %v2250_v27 = vld [vmem:[#allocation7 + $0xa8] ss:$16 sps:$4 sm:$0xff]   ;;  %v2255_v28 = vld [vmem:[#allocation7 + $0x84] ss:$16 sps:$4 sm:$0xff]  }
  0x59   :  { %343 = vmatpush1.bf16.msra.mxu1 %v2200_v7  ;;  %v2228_v7 = vld [vmem:[%s3048_s3 + $0xb0] sm:$0xff]   ;;  %v2253_v30 = vld [vmem:[#allocation7 + $0x80] ss:$16 sps:$4 sm:$0xff]   ;;  %v2264_v33 = vld [vmem:[#allocation7 + $0x6c] ss:$16 sps:$4 sm:$0xff]  }
  0x5a   :  { %344 = vmatprep.subr.bf16.mxu1 %v2571_v6 }
  0x5b   :  { %2063 = vmatpush3.bf16.msra.mxu0 %v2216_v36  ;;  %v2267_v36 = vld [vmem:[#allocation7 + $0x44] ss:$16 sps:$4 sm:$0xff]  }
  0x5c   :  { %2064 = vmatprep.subr.bf16.mxu0 %v2217_v38  ;;  %v2265_v38 = vld [vmem:[#allocation7 + $0x40] ss:$16 sps:$4 sm:$0xff]  }
  0x5d   :  { %345 = vmatpush1.bf16.msra.mxu1 %v2201_v8  ;;  %v2229_v8 = vld [vmem:[%s3048_s3 + $0xa8] sm:$0xff]  }
  0x5e   :  { %346 = vmatprep.subr.bf16.mxu1 %v2571_v6 }
  0x5f   :  { %2065 = vmatpush3.bf16.msra.mxu0 %v2218_v40  ;;  %v2273_v40 = vld [vmem:[#allocation7 + $0x24] ss:$16 sps:$4 sm:$0xff]  }
  0x60   :  { %2066 = vmatprep.subr.bf16.mxu0 %v2219_v41  ;;  %v2276_v41 = vld [vmem:[#allocation7 + $0x2c] ss:$16 sps:$4 sm:$0xff]  }
  0x61   :  { %347 = vmatpush1.bf16.msra.mxu1 %v2202_v9  ;;  %v2230_v9 = vld [vmem:[%s3048_s3 + $0xa0] sm:$0xff]  }
  0x62   :  { %348 = vmatprep.subr.bf16.mxu1 %v2571_v6 }
  0x63   :  { %2067 = vmatpush3.bf16.msra.mxu0 %v2220_v42  ;;  %v2271_v42 = vld [vmem:[#allocation7 + $0x20] ss:$16 sps:$4 sm:$0xff]  }
  0x64   :  { %2068 = vmatprep.subr.bf16.mxu0 %v2221_v51 }
  0x65   :  { %349 = vmatpush1.bf16.msra.mxu1 %v2203_v10  ;;  %v2231_v10 = vld [vmem:[%s3048_s3 + $0x98] sm:$0xff]  }
  0x66   :  { %350 = vmatprep.subr.bf16.mxu1 %v2571_v6 }
  0x67   :  { %2069 = vmatpush3.bf16.msra.mxu0 %v2222_v52 }
  0x68   :  { %2070 = vmatprep.subr.bf16.mxu0 %v2223_v53 }
  0x69   :  { %351 = vmatpush1.bf16.msra.mxu1 %v2204_v11  ;;  %v2232_v11 = vld [vmem:[%s3048_s3 + $0x90] sm:$0xff]  }
  0x6a   :  { %352 = vmatprep.subr.bf16.mxu1 %v2571_v6 }
  0x6b   :  { %2071 = vmatpush3.bf16.msra.mxu0 %v2224_v54 }
  0x6c   :  { %2072 = vmatprep.subr.bf16.mxu0 %v2225_v55  ;;  %v1927_v55 = vld [vmem:[%s3053_s8 + $0x2] ss:$0 sm:$0xff] }
  0x6d   :  { %353 = vmatpush1.bf16.msra.mxu1 %v2205_v12  ;;  %v2233_v12 = vld [vmem:[%s3048_s3 + $0x88] sm:$0xff]  }
  0x6e   :  { %354 = vmatprep.subr.bf16.mxu1 %v2571_v6 }
  0x6f   :  { %2073 = vmatpush3.bf16.msra.mxu0 %v2226_v56 }
  0x70   :  { %2115 = vmatprep.subr.bf16.mxu0 %v2572_v57 }
  0x71   :  { %355 = vmatpush1.bf16.msra.mxu1 %v2206_v13  ;;  %v2234_v13 = vld [vmem:[%s3048_s3 + $0x80] sm:$0xff]  }
  0x72   :  { %364 = vmatprep.subr.bf16.mxu1 %v2571_v6 }
  0x75   :  { %365 = vmatpush2.bf16.msra.mxu1 %v2207_v14 }
  0x76   :  { %366 = vmatprep.subr.bf16.mxu1 %v2571_v6 }
  0x79   :  { %367 = vmatpush2.bf16.msra.mxu1 %v2208_v15 }
  0x7a   :  { %368 = vmatprep.subr.bf16.mxu1 %v2571_v6 }
  0x7d   :  { %369 = vmatpush2.bf16.msra.mxu1 %v2209_v16  ;;  %v2235_v16 = vld [vmem:[#allocation7 + $0xe0] ss:$16 sps:$4 sm:$0xff]  }
  0x7e   :  { %370 = vmatprep.subr.bf16.mxu1 %v2571_v6 }
  0x81   :  { %371 = vmatpush2.bf16.msra.mxu1 %v2210_v19  ;;  %v2240_v19 = vld [vmem:[#allocation7 + $0xec] ss:$16 sps:$4 sm:$0xff]  }
 0x114   :  { %v2113_v17 = vpop.f32.mrf.mxu1 }
 0x116   :  { %v193_v18 = vpop.f32.mrf.mxu1 }
 0x118   :  { %v2114_v21 = vpop.f32.mrf.mxu1 }
 0x119   :  { %v217_v22 = vmax.f32 %v2113_v17, %v2114_v21  ;;  %v2237_v17 = vld [vmem:[#allocation7 + $0xe4] ss:$16 sps:$4 sm:$0xff]   ;;  %v2241_v21 = vld [vmem:[#allocation7 + $0xc0] ss:$16 sps:$4 sm:$0xff]  }
 0x11a   :  { %v196_v23 = vpop.f32.mrf.mxu1  ;;  %893 = vmatprep.subr.bf16.mxu1 %v2237_v17  ;;  %v2825_v17 = vld [vmem:[#allocation8 + $0x6c] ss:$16 sps:$4 sm:$0xff]  }
 0x11b   :  { %v218_v24 = vadd.f32 %v1912_v20, %v217_v22  ;;  %v208_v25 = vmax.f32 %v193_v18, %v196_v23  ;;  %v2238_v18 = vld [vmem:[#allocation7 + $0xe8] ss:$16 sps:$4 sm:$0xff]   ;;  %v2246_v22 = vld [vmem:[#allocation7 + $0xcc] ss:$16 sps:$4 sm:$0xff]  }
 0x11c   :  { %v2244_v23 = vld [vmem:[#allocation7 + $0xc8] ss:$16 sps:$4 sm:$0xff]  }
 0x11d   :  { %v215_v29 = vadd.f32 %v1912_v20, %v208_v25  ;;  %v219_v31 = vmax.f32 %v218_v24, 0.0  ;;  %v2243_v20 = vld [vmem:[#allocation7 + $0xc4] ss:$16 sps:$4 sm:$0xff]   ;;  %v2252_v25 = vld [vmem:[#allocation7 + $0xac] ss:$16 sps:$4 sm:$0xff]  }
 0x11e   :  { %v2249_v24 = vld [vmem:[#allocation7 + $0xa4] ss:$16 sps:$4 sm:$0xff]  }
 0x11f   :  { %v216_v32 = vmax.f32 %v215_v29, 0.0  ;;  %v221_v43 = vrot.slane %v219_v31, 6  ;;  %v2258_v29 = vld [vmem:[#allocation7 + $0x8c] ss:$16 sps:$4 sm:$0xff]  }
 0x121   :  { %v231_v34 = vrot.slane %v216_v32, 2  ;;  %v2190_v35 = vpack.i.bf16 %v219_v31, %v216_v32  ;;  %v224_v47 = vsel %vm223_vm4, 0.0, %v221_v43  ;;  %v2274_v43 = vld [vmem:[#allocation7 + $0x28] ss:$16 sps:$4 sm:$0xff]  }
 0x123   :  { %2191 = vrot.lane.b32.xlu0 %v2190_v35, %s2562_s12  ;;  %v234_v37 = vsel %vm233_vm2, %v231_v34, 0.0  ;;  %v2259_v34 = vld [vmem:[#allocation7 + $0x60] ss:$16 sps:$4 sm:$0xff]   ;;  %v2262_v35 = vld [vmem:[#allocation7 + $0x68] ss:$16 sps:$4 sm:$0xff]  }
 0x124   :  { %v264_v39 = vpack.c.bf16 %v234_v37, %v219_v31  ;;  %v2256_v31 = vld [vmem:[#allocation7 + $0x88] ss:$16 sps:$4 sm:$0xff]   ;;  %v2270_v37 = vld [vmem:[#allocation7 + $0x4c] ss:$16 sps:$4 sm:$0xff]  }
 0x126   :  { %1925 = vmatprep.mubr.msk.bf16.mxu1 %vm229_vm3, %v264_v39  ;;  %v2268_v39 = vld [vmem:[#allocation7 + $0x48] ss:$16 sps:$4 sm:$0xff]  }
 0x195   :  { %v2192_v44 = vpop.permute.xlu0 %2191 }
 0x196   :  { %v2194_v45 = vunpack.i.h.bf16 %v2192_v44  ;;  %v2193_v46 = vunpack.i.l.bf16 %v2192_v44  ;;  %v2279_v44 = vld [vmem:[#allocation7 + $0x4] ss:$16 sps:$4 sm:$0xff]  }
 0x198   :  { %v238_v48 = vsel %vm229_vm3, %v216_v32, %v2194_v45  ;;  %v230_v49 = vsel %vm229_vm3, %v224_v47, %v2193_v46  ;;  %v2261_v32 = vld [vmem:[#allocation7 + $0x64] ss:$16 sps:$4 sm:$0xff]   ;;  %v2282_v45 = vld [vmem:[#allocation7 + $0xc] ss:$16 sps:$4 sm:$0xff]   ;;  %v2277_v46 = vld [vmem:[#allocation7] ss:$16 sps:$4 sm:$0xff]  }
 0x199   :  { %v263_v50 = vpack.c.bf16 %v238_v48, %v230_v49  ;;  %v2280_v47 = vld [vmem:[#allocation7 + $0x8] ss:$16 sps:$4 sm:$0xff]   ;;  %v2772_v48 = vld [vmem:[#allocation8 + $0xe4] ss:$16 sps:$4 sm:$0xff]   ;;  %v2774_v49 = vld [vmem:[#allocation8 + $0xec] ss:$16 sps:$4 sm:$0xff]  }
 0x19b   :  { %373 = vmatmul.mubr.bf16.vlgmr.msra.gmra.mxu1 %v263_v50 }
 0x19c   :  { %925 = vmatprep.mubr.bf16.mxu1 %v2571_v6  ;;  %894 = vmatpush1.bf16.msra.mxu1 %v2235_v16  ;;  %v2823_v16 = vld [vmem:[#allocation8 + $0x64] ss:$16 sps:$4 sm:$0xff]  }
 0x19d   :  { %895 = vmatprep.subr.bf16.mxu1 %v2243_v20  ;;  %v2835_v20 = vld [vmem:[#allocation8 + $0x44] ss:$16 sps:$4 sm:$0xff]  }
 0x1a0   :  { %896 = vmatpush1.bf16.msra.mxu1 %v2241_v21  ;;  %v2837_v21 = vld [vmem:[#allocation8 + $0x4c] ss:$16 sps:$4 sm:$0xff]  }
 0x1a1   :  { %897 = vmatprep.subr.bf16.mxu1 %v2249_v24  ;;  %v2847_v24 = vld [vmem:[#allocation8 + $0x24] ss:$16 sps:$4 sm:$0xff]  }
 0x1a4   :  { %898 = vmatpush1.bf16.msra.mxu1 %v2247_v26  ;;  %v2853_v26 = vld [vmem:[#allocation8 + $0x20] ss:$16 sps:$4 sm:$0xff]  }
 0x1a5   :  { %899 = vmatprep.subr.bf16.mxu1 %v2255_v28  ;;  %v2859_v28 = vld [vmem:[#allocation8 + $0x4] ss:$16 sps:$4 sm:$0xff]  }
 0x1a8   :  { %900 = vmatpush1.bf16.msra.mxu1 %v2253_v30  ;;  %v2865_v30 = vld [vmem:[#allocation8] ss:$16 sps:$4 sm:$0xff]  }
 0x1a9   :  { %901 = vmatprep.subr.bf16.mxu1 %v2261_v32 }
 0x1ac   :  { %902 = vmatpush1.bf16.msra.mxu1 %v2259_v34 }
 0x1ad   :  { %903 = vmatprep.subr.bf16.mxu1 %v2267_v36 }
 0x1b0   :  { %904 = vmatpush1.bf16.msra.mxu1 %v2265_v38 }
 0x1b1   :  { %905 = vmatprep.subr.bf16.mxu1 %v2273_v40  ;;  %v713_v40 = vlaneseq }
 0x1b4   :  { %906 = vmatpush1.bf16.msra.mxu1 %v2271_v42 }
 0x1b5   :  { %907 = vmatprep.subr.bf16.mxu1 %v2279_v44 }
 0x1b8   :  { %908 = vmatpush1.bf16.msra.mxu1 %v2277_v46 }
 0x1b9   :  { %1167 = vmatprep.subr.bf16.mxu1 %v2772_v48 }
 0x25b   :  { %v374_v58 = vpop.f32.mrf.mxu1 }
 0x25d   :  { %v376_v59 = vpop.f32.mrf.mxu1 }
 0x25f   :  { %v377_v61 = vpop.f32.mrf.mxu1 }
 0x260   :  { %v381_v62 = vmax.f32 %v374_v58, %v377_v61 }
 0x261   :  { %v379_v63 = vpop.f32.mrf.mxu1 }
 0x262   :  { %v388_v0 = vadd.f32 %v1926_v60, %v381_v62  ;;  %v2781_v63 = vld [vmem:[#allocation8 + $0xe0] ss:$16 sps:$4 sm:$0xff]  }
 0x264   :  { %v389_v1 = vmax.f32 %v388_v0, 0.0  ;;  %v2783_v0 = vld [vmem:[#allocation8 + $0xe8] ss:$16 sps:$4 sm:$0xff]  }
 0x266   :  { %v391_v2 = vrot.slane %v389_v1, 6  ;;  %v446_v3 = vpack.c.bf16 %v389_v1, %v389_v1  ;;  %v394_v14 = vrot.slane %v389_v1, 2 }
 0x268   :  { %630 = vmatprep.mubr.bf16.mxu0 %v446_v3  ;;  %v1955_v5 = vpack.c.bf16 %v391_v2, %v391_v2  ;;  %v1958_v15 = vpack.c.bf16 %v394_v14, %v394_v14  ;;  %v2785_v2 = vld [vmem:[#allocation8 + $0xc4] ss:$16 sps:$4 sm:$0xff]   ;;  %v2787_v3 = vld [vmem:[#allocation8 + $0xcc] ss:$16 sps:$4 sm:$0xff]   ;;  %v2817_v14 = vld [vmem:[#allocation8 + $0x80] ss:$16 sps:$4 sm:$0xff]  }
 0x26a   :  { %1956 = vmatmul.mubr.msk.bf16.vlgmr.msra.gmra.mxu0 %vm1954_vm6, %v1955_v5  ;;  %v2791_v5 = vld [vmem:[#allocation8 + $0xc0] ss:$16 sps:$4 sm:$0xff]  }
 0x26b   :  { %2116 = vmatpush3.bf16.msra.mxu0 %v2227_v4  ;;  %2131 = vmatprep.mubr.msk.bf16.mxu0 %vm2573_vm7, %v2572_v57 }
 0x26c   :  { %2117 = vmatprep.subr.bf16.mxu0 %v2572_v57 }
 0x26f   :  { %2118 = vmatpush3.bf16.msra.mxu0 %v2228_v7  ;;  %v2793_v7 = vld [vmem:[#allocation8 + $0xc8] ss:$16 sps:$4 sm:$0xff]  }
 0x270   :  { %2119 = vmatprep.subr.bf16.mxu0 %v2572_v57 }
 0x273   :  { %2120 = vmatpush3.bf16.msra.mxu0 %v2229_v8  ;;  %v2797_v8 = vld [vmem:[#allocation8 + $0xa4] ss:$16 sps:$4 sm:$0xff]  }
 0x274   :  { %2121 = vmatprep.subr.bf16.mxu0 %v2572_v57 }
 0x277   :  { %2122 = vmatpush3.bf16.msra.mxu0 %v2230_v9  ;;  %v2799_v9 = vld [vmem:[#allocation8 + $0xac] ss:$16 sps:$4 sm:$0xff]  }
 0x278   :  { %2123 = vmatprep.subr.bf16.mxu0 %v2572_v57 }
 0x27b   :  { %2124 = vmatpush3.bf16.msra.mxu0 %v2231_v10  ;;  %v2805_v10 = vld [vmem:[#allocation8 + $0xa0] ss:$16 sps:$4 sm:$0xff]  }
 0x27c   :  { %2125 = vmatprep.subr.bf16.mxu0 %v2572_v57 }
 0x27f   :  { %2126 = vmatpush3.bf16.msra.mxu0 %v2232_v11  ;;  %v2807_v11 = vld [vmem:[#allocation8 + $0xa8] ss:$16 sps:$4 sm:$0xff]  }
 0x280   :  { %2127 = vmatprep.subr.bf16.mxu0 %v2572_v57 }
 0x283   :  { %2128 = vmatpush3.bf16.msra.mxu0 %v2233_v12  ;;  %v2811_v12 = vld [vmem:[#allocation8 + $0x84] ss:$16 sps:$4 sm:$0xff]  }
 0x284   :  { %2129 = vmatprep.subr.bf16.mxu0 %v2572_v57 }
 0x287   :  { %2130 = vmatpush3.bf16.msra.mxu0 %v2234_v13  ;;  %v2813_v13 = vld [vmem:[#allocation8 + $0x8c] ss:$16 sps:$4 sm:$0xff]  }
 0x288   :  { %934 = vmatprep.subr.bf16.mxu0 %v2240_v19  ;;  %v2831_v19 = vld [vmem:[#allocation8 + $0x68] ss:$16 sps:$4 sm:$0xff]  }
 0x28a   :  { %2132 = vmatmul.mubr.msk.bf16.vlgmr.msra.gmra.mxu0 %vm1957_vm8, %v1958_v15  ;;  %v2819_v15 = vld [vmem:[#allocation8 + $0x88] ss:$16 sps:$4 sm:$0xff]  }
 0x28b   :  { %966 = vmatprep.mubr.bf16.mxu0 %v2571_v6  ;;  %935 = vmatpush1.bf16.msra.mxu0 %v2238_v18  ;;  %v2829_v18 = vld [vmem:[#allocation8 + $0x60] ss:$16 sps:$4 sm:$0xff]  }
 0x28c   :  { %936 = vmatprep.subr.bf16.mxu0 %v2246_v22  ;;  %v2841_v22 = vld [vmem:[#allocation8 + $0x40] ss:$16 sps:$4 sm:$0xff]  }
 0x28f   :  { %937 = vmatpush1.bf16.msra.mxu0 %v2244_v23  ;;  %v2843_v23 = vld [vmem:[#allocation8 + $0x48] ss:$16 sps:$4 sm:$0xff]  }
 0x290   :  { %938 = vmatprep.subr.bf16.mxu0 %v2252_v25  ;;  %v2849_v25 = vld [vmem:[#allocation8 + $0x2c] ss:$16 sps:$4 sm:$0xff]  }
 0x293   :  { %939 = vmatpush1.bf16.msra.mxu0 %v2250_v27  ;;  %v2855_v27 = vld [vmem:[#allocation8 + $0x28] ss:$16 sps:$4 sm:$0xff]  }
 0x294   :  { %940 = vmatprep.subr.bf16.mxu0 %v2258_v29  ;;  %v2861_v29 = vld [vmem:[#allocation8 + $0xc] ss:$16 sps:$4 sm:$0xff]  }
 0x297   :  { %941 = vmatpush1.bf16.msra.mxu0 %v2256_v31  ;;  %v2867_v31 = vld [vmem:[#allocation8 + $0x8] ss:$16 sps:$4 sm:$0xff]  }
 0x298   :  { %942 = vmatprep.subr.bf16.mxu0 %v2264_v33 }
 0x29b   :  { %943 = vmatpush1.bf16.msra.mxu0 %v2262_v35 }
 0x29c   :  { %944 = vmatprep.subr.bf16.mxu0 %v2270_v37 }
 0x29f   :  { %945 = vmatpush1.bf16.msra.mxu0 %v2268_v39 }
 0x2a0   :  { %946 = vmatprep.subr.bf16.mxu0 %v2276_v41  ;;  %v714_v41 = vshrl.u32 %v713_v40, 7 }
 0x2a2   :  { %v715_v42 = vsub.s32 0, %v714_v41  ;;  %v719_v44 = vsub.s32 1, %v714_v41 }
 0x2a3   :  { %947 = vmatpush1.bf16.msra.mxu0 %v2274_v43  ;;  %v119_v43 = vld [vmem:[%s3053_s8 + $0x3] sm:$0xf] }
 0x2a4   :  { %948 = vmatprep.subr.bf16.mxu0 %v2282_v45  ;;  %v716_v45 = vrot.slane %v119_v43, %v715_v42  ;;  %v720_v46 = vrot.slane %v119_v43, %v719_v44 }
 0x2a7   :  { %949 = vmatpush1.bf16.msra.mxu0 %v2280_v47 }
 0x2a8   :  { %1208 = vmatprep.subr.bf16.mxu0 %v2774_v49 }
 0x32a   :  { %v2074_v50 = vpop.f32.mrf.mxu0 }
 0x32c   :  { %v2075_v51 = vpop.f32.mrf.mxu0 }
 0x32d   :  { %v2076_v54 = vadd.f32 %v2075_v51, %v2074_v50 }
 0x32e   :  { %v2077_v52 = vpop.f32.mrf.mxu0 }
 0x32f   :  { %v633_v56 = vadd.f32 %v2076_v54, %v1927_v55  ;;  %v723_v54 = vsub.s32 2, %v714_v41 }
 0x330   :  { %v2078_v53 = vpop.f32.mrf.mxu0 }
 0x34a   :  { %v672_v58 = vpop.f32.mrf.mxu0 }
 0x34b   :  { %v673_v59 = vadd.f32 %v672_v58, %v633_v56 }
 0x34c   :  { %v2133_v60 = vpop.f32.mrf.mxu0 }
 0x34d   :  { %v678_v61 = vmax.f32 %v673_v59, 0.0 }
 0x34e   :  { %v675_v62 = vpop.f32.mrf.mxu0 }
 0x34f   :  { %v711_v1 = vpack.c.bf16 %v678_v61, %v678_v61 }
 0x350   :  { %v2134_v4 = vpop.f32.mrf.mxu0 }
 0x351   :  { %926 = vmatmul.mubr.bf16.vlgmr.msra.gmra.mxu1 %v711_v1  ;;  %967 = vmatmul.mubr.bf16.vlgmr.msra.gmra.mxu0 %v711_v1  ;;  %v724_v1 = vrot.slane %v119_v43, %v723_v54 }
 0x352   :  { %1168 = vmatpush1.bf16.msra.mxu1 %v2781_v63  ;;  %1209 = vmatpush1.bf16.msra.mxu0 %v2783_v0 }
 0x353   :  { %1169 = vmatprep.subr.bf16.mxu1 %v2785_v2  ;;  %1210 = vmatprep.subr.bf16.mxu0 %v2787_v3 }
 0x354   :  { %1199 = vmatprep.mubr.bf16.mxu1 %v2571_v6  ;;  %1240 = vmatprep.mubr.bf16.mxu0 %v2571_v6 }
 0x356   :  { %1170 = vmatpush1.bf16.msra.mxu1 %v2791_v5  ;;  %1211 = vmatpush1.bf16.msra.mxu0 %v2793_v7 }
 0x357   :  { %1171 = vmatprep.subr.bf16.mxu1 %v2797_v8  ;;  %1212 = vmatprep.subr.bf16.mxu0 %v2799_v9 }
 0x35a   :  { %1172 = vmatpush1.bf16.msra.mxu1 %v2805_v10  ;;  %1213 = vmatpush1.bf16.msra.mxu0 %v2807_v11 }
 0x35b   :  { %1173 = vmatprep.subr.bf16.mxu1 %v2811_v12  ;;  %1214 = vmatprep.subr.bf16.mxu0 %v2813_v13 }
 0x35e   :  { %1174 = vmatpush1.bf16.msra.mxu1 %v2817_v14  ;;  %1215 = vmatpush1.bf16.msra.mxu0 %v2819_v15 }
 0x35f   :  { %1175 = vmatprep.subr.bf16.mxu1 %v2823_v16  ;;  %1216 = vmatprep.subr.bf16.mxu0 %v2825_v17 }
 0x362   :  { %1176 = vmatpush1.bf16.msra.mxu1 %v2829_v18  ;;  %1217 = vmatpush1.bf16.msra.mxu0 %v2831_v19 }
 0x363   :  { %1177 = vmatprep.subr.bf16.mxu1 %v2835_v20  ;;  %1218 = vmatprep.subr.bf16.mxu0 %v2837_v21 }
 0x366   :  { %1178 = vmatpush1.bf16.msra.mxu1 %v2841_v22  ;;  %1219 = vmatpush1.bf16.msra.mxu0 %v2843_v23 }
 0x367   :  { %1179 = vmatprep.subr.bf16.mxu1 %v2847_v24  ;;  %1220 = vmatprep.subr.bf16.mxu0 %v2849_v25 }
 0x36a   :  { %1180 = vmatpush1.bf16.msra.mxu1 %v2853_v26  ;;  %1221 = vmatpush1.bf16.msra.mxu0 %v2855_v27 }
 0x36b   :  { %1181 = vmatprep.subr.bf16.mxu1 %v2859_v28  ;;  %1222 = vmatprep.subr.bf16.mxu0 %v2861_v29 }
 0x36e   :  { %1182 = vmatpush1.bf16.msra.mxu1 %v2865_v30  ;;  %1223 = vmatpush1.bf16.msra.mxu0 %v2867_v31 }
 0x36f   :  { %1278 = vmatprep.subr.bf16.mxu1 %v2772_v48  ;;  %1319 = vmatprep.subr.bf16.mxu0 %v2774_v49 }
 0x371   :  { %1200 = vmatmul.mubr.bf16.vlgmr.msra.gmra.mxu1 %v2571_v6  ;;  %1241 = vmatmul.mubr.bf16.vlgmr.msra.gmra.mxu0 %v2571_v6 }
 0x372   :  { %1279 = vmatpush1.bf16.msra.mxu1 %v2781_v63  ;;  %1320 = vmatpush1.bf16.msra.mxu0 %v2783_v0 }
 0x373   :  { %1280 = vmatprep.subr.bf16.mxu1 %v2785_v2  ;;  %1321 = vmatprep.subr.bf16.mxu0 %v2787_v3 }
 0x374   :  { %1310 = vmatprep.mubr.bf16.mxu1 %v2571_v6  ;;  %1351 = vmatprep.mubr.bf16.mxu0 %v2571_v6 }
 0x376   :  { %1281 = vmatpush1.bf16.msra.mxu1 %v2791_v5  ;;  %1322 = vmatpush1.bf16.msra.mxu0 %v2793_v7 }
 0x377   :  { %1282 = vmatprep.subr.bf16.mxu1 %v2797_v8  ;;  %1323 = vmatprep.subr.bf16.mxu0 %v2799_v9 }
 0x37a   :  { %1283 = vmatpush1.bf16.msra.mxu1 %v2805_v10  ;;  %1324 = vmatpush1.bf16.msra.mxu0 %v2807_v11 }
 0x37b   :  { %1284 = vmatprep.subr.bf16.mxu1 %v2811_v12  ;;  %1325 = vmatprep.subr.bf16.mxu0 %v2813_v13 }
 0x37e   :  { %1285 = vmatpush1.bf16.msra.mxu1 %v2817_v14  ;;  %1326 = vmatpush1.bf16.msra.mxu0 %v2819_v15 }
 0x37f   :  { %1286 = vmatprep.subr.bf16.mxu1 %v2823_v16  ;;  %1327 = vmatprep.subr.bf16.mxu0 %v2825_v17 }
 0x382   :  { %1287 = vmatpush1.bf16.msra.mxu1 %v2829_v18  ;;  %1328 = vmatpush1.bf16.msra.mxu0 %v2831_v19 }
 0x383   :  { %1288 = vmatprep.subr.bf16.mxu1 %v2835_v20  ;;  %1329 = vmatprep.subr.bf16.mxu0 %v2837_v21 }
 0x386   :  { %1289 = vmatpush1.bf16.msra.mxu1 %v2841_v22  ;;  %1330 = vmatpush1.bf16.msra.mxu0 %v2843_v23 }
 0x387   :  { %1290 = vmatprep.subr.bf16.mxu1 %v2847_v24  ;;  %1331 = vmatprep.subr.bf16.mxu0 %v2849_v25 }
 0x38a   :  { %1291 = vmatpush1.bf16.msra.mxu1 %v2853_v26  ;;  %1332 = vmatpush1.bf16.msra.mxu0 %v2855_v27 }
 0x38b   :  { %1292 = vmatprep.subr.bf16.mxu1 %v2859_v28  ;;  %1333 = vmatprep.subr.bf16.mxu0 %v2861_v29 }
 0x38e   :  { %1293 = vmatpush1.bf16.msra.mxu1 %v2865_v30  ;;  %1334 = vmatpush1.bf16.msra.mxu0 %v2867_v31 }
 0x38f   :  { %1407 = vmatprep.subr.bf16.mxu1 %v2772_v48  ;;  %1448 = vmatprep.subr.bf16.mxu0 %v2774_v49 }
 0x411   :  { %v927_v32 = vpop.f32.mrf.mxu1  ;;  %v968_v33 = vpop.f32.mrf.mxu0 }
 0x412   :  { %v2914_v47 = vadd.f32 %v927_v32, %v716_v45 }
 0x413   :  { %v929_v34 = vpop.f32.mrf.mxu1  ;;  %v970_v35 = vpop.f32.mrf.mxu0 }
 0x414   :  { %v2916_v52 = vadd.f32 %v929_v34, %v720_v46 }
 0x415   :  { %v931_v36 = vpop.f32.mrf.mxu1  ;;  %v972_v37 = vpop.f32.mrf.mxu0 }
 0x416   :  { %v727_v36 = vsub.s32 3, %v714_v41  ;;  %v2920_v37 = vadd.f32 %v968_v33, %v724_v1 }
 0x417   :  { %v932_v38 = vpop.f32.mrf.mxu1  ;;  %v973_v39 = vpop.f32.mrf.mxu0 }
 0x418   :  { %v728_v34 = vrot.slane %v119_v43, %v727_v36 }
 0x41a   :  { %v2923_v39 = vadd.f32 %v970_v35, %v728_v34 }
 0x431   :  { %v1201_v50 = vpop.f32.mrf.mxu1  ;;  %v1242_v51 = vpop.f32.mrf.mxu0 }
 0x432   :  { %v1249_v53 = vadd.f32 %v1201_v50, %v2914_v47  ;;  %v1251_v38 = vadd.f32 %v1242_v51, %v2920_v37 }
 0x433   :  { %v1203_v55 = vpop.f32.mrf.mxu1  ;;  %v1244_v56 = vpop.f32.mrf.mxu0 }
 0x434   :  { %v2024_v58 = vmul.f32 -1.442695, %v1249_v53  ;;  %v1250_v59 = vadd.f32 %v1203_v55, %v2916_v52  ;;  %v2026_v40 = vmul.f32 -1.442695, %v1251_v38  ;;  %v1252_v44 = vadd.f32 %v1244_v56, %v2923_v39 }
 0x435   :  { %v1205_v60 = vpop.f32.mrf.mxu1  ;;  %v1246_v61 = vpop.f32.mrf.mxu0 }
 0x436   :  { %2347 = vpow2.f32 %v2024_v58  ;;  %v2025_v62 = vmul.f32 -1.442695, %v1250_v59 }
 0x437   :  { %v1206_v4 = vpop.f32.mrf.mxu1  ;;  %v1247_v32 = vpop.f32.mrf.mxu0 }
 0x438   :  { %2349 = vpow2.f32 %v2025_v62 }
 0x439   :  { %2351 = vpow2.f32 %v2026_v40 }
 0x443   :  { %v2348_v42 = vpop.eup %2347 }
 0x444   :  { %v1262_v45 = vadd.f32 1.0, %v2348_v42 }
 0x445   :  { %v2350_v46 = vpop.eup %2349 }
 0x446   :  { %2353 = vrcp.f32 %v1262_v45  ;;  %v1263_v50 = vadd.f32 1.0, %v2350_v46  ;;  %v2352_v53 = vpop.eup %2351 }
 0x447   :  { %2355 = vtanh.f32 %v1252_v44  ;;  %v1264_v43 = vadd.f32 1.0, %v2352_v53 }
 0x448   :  { %2357 = vrcp.f32 %v1263_v50 }
 0x449   :  { %2359 = vrcp.f32 %v1264_v43 }
 0x453   :  { %v2354_v41 = vpop.eup %2353 }
 0x454   :  { %v2356_v33 = vpop.eup %2355 }
 0x455   :  { %v2358_v54 = vpop.eup %2357  ;;  %v1273_v51 = vmul.f32 %v2356_v33, %v2354_v41 }
 0x456   :  { %v1272_v55 = vmul.f32 0.0, %v2358_v54  ;;  %v2360_v56 = vpop.eup %2359 }
 0x458   :  { %v2926_v35 = vadd.f32 %v1273_v51, %v1272_v55 }
 0x45a   :  { %2361 = vtanh.f32 %v2926_v35 }
 0x467   :  { %v2362_v58 = vpop.eup %2361 }
 0x468   :  { %v1276_v59 = vmul.f32 %v2362_v58, %v2360_v56 }
 0x46a   :  { %v1277_v60 = vpack.c.bf16 %v1276_v59, %v1276_v59 }
 0x46c   :  { %1311 = vmatmul.mubr.bf16.vlgmr.msra.gmra.mxu1 %v1277_v60  ;;  %1352 = vmatmul.mubr.bf16.vlgmr.msra.gmra.mxu0 %v1277_v60  ;;  %v1396_v60 = vrot.slane %v2926_v35, 6 }
 0x46d   :  { %1408 = vmatpush1.bf16.msra.mxu1 %v2781_v63  ;;  %1449 = vmatpush1.bf16.msra.mxu0 %v2783_v0 }
 0x46e   :  { %1409 = vmatprep.subr.bf16.mxu1 %v2785_v2  ;;  %1450 = vmatprep.subr.bf16.mxu0 %v2787_v3 }
 0x46f   :  { %1439 = vmatprep.mubr.bf16.mxu1 %v2571_v6  ;;  %1480 = vmatprep.mubr.bf16.mxu0 %v2571_v6 }
 0x471   :  { %1410 = vmatpush1.bf16.msra.mxu1 %v2791_v5  ;;  %1451 = vmatpush1.bf16.msra.mxu0 %v2793_v7 }
 0x472   :  { %1411 = vmatprep.subr.bf16.mxu1 %v2797_v8  ;;  %1452 = vmatprep.subr.bf16.mxu0 %v2799_v9 }
 0x475   :  { %1412 = vmatpush1.bf16.msra.mxu1 %v2805_v10  ;;  %1453 = vmatpush1.bf16.msra.mxu0 %v2807_v11 }
 0x476   :  { %1413 = vmatprep.subr.bf16.mxu1 %v2811_v12  ;;  %1454 = vmatprep.subr.bf16.mxu0 %v2813_v13 }
 0x479   :  { %1414 = vmatpush1.bf16.msra.mxu1 %v2817_v14  ;;  %1455 = vmatpush1.bf16.msra.mxu0 %v2819_v15 }
 0x47a   :  { %1415 = vmatprep.subr.bf16.mxu1 %v2823_v16  ;;  %1456 = vmatprep.subr.bf16.mxu0 %v2825_v17 }
 0x47d   :  { %1416 = vmatpush1.bf16.msra.mxu1 %v2829_v18  ;;  %1457 = vmatpush1.bf16.msra.mxu0 %v2831_v19 }
 0x47e   :  { %1417 = vmatprep.subr.bf16.mxu1 %v2835_v20  ;;  %1458 = vmatprep.subr.bf16.mxu0 %v2837_v21 }
 0x481   :  { %1418 = vmatpush1.bf16.msra.mxu1 %v2841_v22  ;;  %1459 = vmatpush1.bf16.msra.mxu0 %v2843_v23 }
 0x482   :  { %1419 = vmatprep.subr.bf16.mxu1 %v2847_v24  ;;  %1460 = vmatprep.subr.bf16.mxu0 %v2849_v25 }
 0x485   :  { %1420 = vmatpush1.bf16.msra.mxu1 %v2853_v26  ;;  %1461 = vmatpush1.bf16.msra.mxu0 %v2855_v27 }
 0x486   :  { %1421 = vmatprep.subr.bf16.mxu1 %v2859_v28  ;;  %1462 = vmatprep.subr.bf16.mxu0 %v2861_v29 }
 0x489   :  { %1422 = vmatpush1.bf16.msra.mxu1 %v2865_v30  ;;  %1463 = vmatpush1.bf16.msra.mxu0 %v2867_v31 }
 0x48a   :  { %1536 = vmatprep.subr.bf16.mxu1 %v2772_v48  ;;  %1577 = vmatprep.subr.bf16.mxu0 %v2774_v49 }
 0x52c   :  { %v1312_v61 = vpop.f32.mrf.mxu1  ;;  %v1353_v62 = vpop.f32.mrf.mxu0 }
 0x52d   :  { %v1364_v1 = vrot.slane %v1312_v61, 6  ;;  %v1366_v48 = vrot.slane %v1353_v62, 6 }
 0x52e   :  { %v1314_v4 = vpop.f32.mrf.mxu1  ;;  %v1355_v32 = vpop.f32.mrf.mxu0 }
 0x52f   :  { %v1372_v36 = vadd.f32 %v1364_v1, %v2914_v47  ;;  %v1365_v34 = vrot.slane %v1314_v4, 6  ;;  %v1374_v49 = vadd.f32 %v1366_v48, %v2920_v37  ;;  %v1367_v53 = vrot.slane %v1355_v32, 6 }
 0x530   :  { %v1316_v38 = vpop.f32.mrf.mxu1  ;;  %v1357_v40 = vpop.f32.mrf.mxu0 }
 0x531   :  { %v2027_v42 = vmul.f32 -1.442695, %v1372_v36  ;;  %v1373_v44 = vadd.f32 %v1365_v34, %v2916_v52  ;;  %v2029_v41 = vmul.f32 -1.442695, %v1374_v49  ;;  %v1375_v54 = vadd.f32 %v1367_v53, %v2923_v39  ;;  %v2331_v49 = vld [vmem:[#allocation10 + $0x38] sm:$0xff]   ;;  %v2332_v53 = vld [vmem:[#allocation10 + $0x30] sm:$0xff]  }
 0x532   :  { %v1317_v45 = vpop.f32.mrf.mxu1  ;;  %v1358_v46 = vpop.f32.mrf.mxu0 }
 0x533   :  { %2363 = vpow2.f32 %v2027_v42  ;;  %v2028_v50 = vmul.f32 -1.442695, %v1373_v44 }
 0x535   :  { %2365 = vpow2.f32 %v2028_v50 }
 0x536   :  { %2367 = vpow2.f32 %v2029_v41  ;;  %v2333_v41 = vld [vmem:[#allocation10 + $0x28] sm:$0xff]  }
 0x540   :  { %v2364_v33 = vpop.eup %2363 }
 0x541   :  { %v1385_v43 = vadd.f32 1.0, %v2364_v33  ;;  %v2334_v33 = vld [vmem:[#allocation10 + $0x20] sm:$0xff]  }
 0x542   :  { %v2366_v55 = vpop.eup %2365 }
 0x543   :  { %2369 = vrcp.f32 %v1385_v43  ;;  %v1386_v51 = vadd.f32 1.0, %v2366_v55  ;;  %v2368_v56 = vpop.eup %2367  ;;  %v2336_v43 = vld [vmem:[#allocation10 + $0x10] sm:$0xff]   ;;  %v2337_v55 = vld [vmem:[#allocation10 + $0x8] sm:$0xff]  }
 0x544   :  { %2371 = vtanh.f32 %v1375_v54  ;;  %v1387_v62 = vadd.f32 1.0, %v2368_v56  ;;  %v2335_v54 = vld [vmem:[#allocation10 + $0x18] sm:$0xff]  }
 0x545   :  { %2373 = vrcp.f32 %v1386_v51  ;;  %v2338_v51 = vld [vmem:[#allocation10] sm:$0xff]   ;;  %v2339_v56 = vld [vmem:[#allocation11 + $0x38] sm:$0xff]  }
 0x546   :  { %2375 = vrcp.f32 %v1387_v62  ;;  %v2344_v62 = vld [vmem:[#allocation11 + $0x10] sm:$0xff]  }
 0x550   :  { %v2370_v58 = vpop.eup %2369 }
 0x551   :  { %v2372_v59 = vpop.eup %2371 }
 0x552   :  { %v2374_v61 = vpop.eup %2373  ;;  %v1399_v4 = vmul.f32 %v2372_v59, %v2370_v58  ;;  %v2340_v58 = vld [vmem:[#allocation11 + $0x30] sm:$0xff]   ;;  %v2341_v59 = vld [vmem:[#allocation11 + $0x28] sm:$0xff]  }
 0x553   :  { %v1398_v1 = vmul.f32 %v2374_v61, %v1396_v60  ;;  %v2376_v36 = vpop.eup %2375  ;;  %v2342_v60 = vld [vmem:[#allocation11 + $0x20] sm:$0xff]   ;;  %v2343_v61 = vld [vmem:[#allocation11 + $0x18] sm:$0xff]  }
 0x555   :  { %v2968_v32 = vadd.f32 %v1399_v4, %v1398_v1 }
 0x557   :  { %2377 = vtanh.f32 %v2968_v32 }
 0x564   :  { %v2378_v34 = vpop.eup %2377 }
 0x565   :  { %v1402_v38 = vmul.f32 %v2378_v34, %v2376_v36 }
 0x567   :  { %v1403_v40 = vpack.c.bf16 %v1402_v38, %v1402_v38 }
 0x569   :  { %v1405_v42 = vrot.slane %v1403_v40, 1 }
 0x56b   :  { %1440 = vmatmul.mubr.bf16.vlgmr.msra.gmra.mxu1 %v1405_v42  ;;  %1481 = vmatmul.mubr.bf16.vlgmr.msra.gmra.mxu0 %v1405_v42 }
 0x56c   :  { %1537 = vmatpush1.bf16.msra.mxu1 %v2781_v63  ;;  %1578 = vmatpush1.bf16.msra.mxu0 %v2783_v0 }
 0x56d   :  { %1538 = vmatprep.subr.bf16.mxu1 %v2785_v2  ;;  %1579 = vmatprep.subr.bf16.mxu0 %v2787_v3 }
 0x56e   :  { %1568 = vmatprep.mubr.bf16.mxu1 %v2571_v6  ;;  %1609 = vmatprep.mubr.bf16.mxu0 %v2571_v6 }
 0x570   :  { %1539 = vmatpush1.bf16.msra.mxu1 %v2791_v5  ;;  %1580 = vmatpush1.bf16.msra.mxu0 %v2793_v7 }
 0x571   :  { %1540 = vmatprep.subr.bf16.mxu1 %v2797_v8  ;;  %1581 = vmatprep.subr.bf16.mxu0 %v2799_v9 }
 0x574   :  { %1541 = vmatpush1.bf16.msra.mxu1 %v2805_v10  ;;  %1582 = vmatpush1.bf16.msra.mxu0 %v2807_v11 }
 0x575   :  { %1542 = vmatprep.subr.bf16.mxu1 %v2811_v12  ;;  %1583 = vmatprep.subr.bf16.mxu0 %v2813_v13 }
 0x578   :  { %1543 = vmatpush1.bf16.msra.mxu1 %v2817_v14  ;;  %1584 = vmatpush1.bf16.msra.mxu0 %v2819_v15 }
 0x579   :  { %1544 = vmatprep.subr.bf16.mxu1 %v2823_v16  ;;  %1585 = vmatprep.subr.bf16.mxu0 %v2825_v17 }
 0x57c   :  { %1545 = vmatpush1.bf16.msra.mxu1 %v2829_v18  ;;  %1586 = vmatpush1.bf16.msra.mxu0 %v2831_v19 }
 0x57d   :  { %1546 = vmatprep.subr.bf16.mxu1 %v2835_v20  ;;  %1587 = vmatprep.subr.bf16.mxu0 %v2837_v21 }
 0x580   :  { %1547 = vmatpush1.bf16.msra.mxu1 %v2841_v22  ;;  %1588 = vmatpush1.bf16.msra.mxu0 %v2843_v23 }
 0x581   :  { %1548 = vmatprep.subr.bf16.mxu1 %v2847_v24  ;;  %1589 = vmatprep.subr.bf16.mxu0 %v2849_v25 }
 0x584   :  { %1549 = vmatpush1.bf16.msra.mxu1 %v2853_v26  ;;  %1590 = vmatpush1.bf16.msra.mxu0 %v2855_v27  ;;  %v1525_v27 = vrot.slane %v2968_v32, 6 }
 0x585   :  { %1550 = vmatprep.subr.bf16.mxu1 %v2859_v28  ;;  %1591 = vmatprep.subr.bf16.mxu0 %v2861_v29 }
 0x588   :  { %1551 = vmatpush1.bf16.msra.mxu1 %v2865_v30  ;;  %1592 = vmatpush1.bf16.msra.mxu0 %v2867_v31 }
 0x589   :  { %2135 = vmatprep.subr.bf16.mxu1 %v2572_v57  ;;  %2155 = vmatprep.subr.bf16.mxu0 %v2572_v57 }
 0x62b   :  { %v1441_v6 = vpop.f32.mrf.mxu1  ;;  %v1482_v63 = vpop.f32.mrf.mxu0 }
 0x62c   :  { %v1493_v0 = vrot.slane %v1441_v6, 4  ;;  %v1495_v15 = vrot.slane %v1482_v63, 4 }
 0x62d   :  { %v1443_v2 = vpop.f32.mrf.mxu1  ;;  %v1484_v3 = vpop.f32.mrf.mxu0 }
 0x62e   :  { %v1501_v5 = vadd.f32 %v1493_v0, %v2914_v47  ;;  %v1494_v7 = vrot.slane %v1443_v2, 4  ;;  %v1503_v16 = vadd.f32 %v1495_v15, %v2920_v37  ;;  %v1496_v17 = vrot.slane %v1484_v3, 4 }
 0x62f   :  { %v1445_v8 = vpop.f32.mrf.mxu1  ;;  %v1486_v9 = vpop.f32.mrf.mxu0 }
 0x630   :  { %v2030_v10 = vmul.f32 -1.442695, %v1501_v5  ;;  %v1502_v11 = vadd.f32 %v1494_v7, %v2916_v52  ;;  %v2032_v18 = vmul.f32 -1.442695, %v1503_v16  ;;  %v1504_v20 = vadd.f32 %v1496_v17, %v2923_v39 }
 0x631   :  { %v1446_v12 = vpop.f32.mrf.mxu1  ;;  %v1487_v13 = vpop.f32.mrf.mxu0 }
 0x632   :  { %2379 = vpow2.f32 %v2030_v10  ;;  %v2031_v14 = vmul.f32 -1.442695, %v1502_v11 }
 0x634   :  { %2381 = vpow2.f32 %v2031_v14 }
 0x635   :  { %2383 = vpow2.f32 %v2032_v18 }
 0x63f   :  { %v2380_v19 = vpop.eup %2379 }
 0x640   :  { %v1514_v21 = vadd.f32 1.0, %v2380_v19 }
 0x641   :  { %v2382_v22 = vpop.eup %2381 }
 0x642   :  { %2385 = vrcp.f32 %v1514_v21  ;;  %v1515_v23 = vadd.f32 1.0, %v2382_v22  ;;  %v2384_v24 = vpop.eup %2383 }
 0x643   :  { %2387 = vtanh.f32 %v1504_v20  ;;  %v1516_v29 = vadd.f32 1.0, %v2384_v24 }
 0x644   :  { %2389 = vrcp.f32 %v1515_v23 }
 0x645   :  { %2391 = vrcp.f32 %v1516_v29 }
 0x64f   :  { %v2386_v25 = vpop.eup %2385 }
 0x650   :  { %v2388_v26 = vpop.eup %2387 }
 0x651   :  { %v2390_v28 = vpop.eup %2389  ;;  %v1528_v31 = vmul.f32 %v2388_v26, %v2386_v25  ;;  %v2345_v26 = vld [vmem:[#allocation11 + $0x8] sm:$0xff]  }
 0x652   :  { %v1527_v30 = vmul.f32 %v2390_v28, %v1525_v27  ;;  %v2392_v44 = vpop.eup %2391  ;;  %v2346_v27 = vld [vmem:[#allocation11] sm:$0xff]   ;;  %v2036_v28 = vld [vmem:[%s3053_s8 + $0x7] ss:$0 sm:$0xff] }
 0x654   :  { %v3010_v35 = vadd.f32 %v1528_v31, %v1527_v30 }
 0x656   :  { %2393 = vtanh.f32 %v3010_v35  ;;  %v1654_v17 = vrot.slane %v3010_v35, 6 }
 0x663   :  { %v2394_v45 = vpop.eup %2393 }
 0x664   :  { %v1531_v46 = vmul.f32 %v2394_v45, %v2392_v44 }
 0x666   :  { %v1532_v50 = vpack.c.bf16 %v1531_v46, %v1531_v46 }
 0x668   :  { %v1534_v48 = vrot.slane %v1532_v50, 2  ;;  %v2045_v50 = vld [vmem:[%s3053_s8 + $0x8] ss:$0 sm:$0xff] }
 0x66a   :  { %1569 = vmatmul.mubr.bf16.vlgmr.msra.gmra.mxu1 %v1534_v48  ;;  %1610 = vmatmul.mubr.bf16.vlgmr.msra.gmra.mxu0 %v1534_v48 }
 0x66b   :  { %2151 = vmatprep.mubr.msk.bf16.mxu1 %vm2573_vm7, %v2572_v57  ;;  %2171 = vmatprep.mubr.msk.bf16.mxu0 %vm2573_vm7, %v2572_v57 }
 0x66c   :  { %2136 = vmatpush3.bf16.msra.mxu1 %v2331_v49  ;;  %2156 = vmatpush3.bf16.msra.mxu0 %v2339_v56 }
 0x66d   :  { %2137 = vmatprep.subr.bf16.mxu1 %v2572_v57  ;;  %2157 = vmatprep.subr.bf16.mxu0 %v2572_v57 }
 0x670   :  { %2138 = vmatpush3.bf16.msra.mxu1 %v2332_v53  ;;  %2158 = vmatpush3.bf16.msra.mxu0 %v2340_v58 }
 0x671   :  { %2139 = vmatprep.subr.bf16.mxu1 %v2572_v57  ;;  %2159 = vmatprep.subr.bf16.mxu0 %v2572_v57 }
 0x674   :  { %2140 = vmatpush3.bf16.msra.mxu1 %v2333_v41  ;;  %2160 = vmatpush3.bf16.msra.mxu0 %v2341_v59 }
 0x675   :  { %2141 = vmatprep.subr.bf16.mxu1 %v2572_v57  ;;  %2161 = vmatprep.subr.bf16.mxu0 %v2572_v57 }
 0x678   :  { %2142 = vmatpush3.bf16.msra.mxu1 %v2334_v33  ;;  %2162 = vmatpush3.bf16.msra.mxu0 %v2342_v60 }
 0x679   :  { %2143 = vmatprep.subr.bf16.mxu1 %v2572_v57  ;;  %2163 = vmatprep.subr.bf16.mxu0 %v2572_v57 }
 0x67c   :  { %2144 = vmatpush3.bf16.msra.mxu1 %v2335_v54  ;;  %2164 = vmatpush3.bf16.msra.mxu0 %v2343_v61 }
 0x67d   :  { %2145 = vmatprep.subr.bf16.mxu1 %v2572_v57  ;;  %2165 = vmatprep.subr.bf16.mxu0 %v2572_v57 }
 0x680   :  { %2146 = vmatpush3.bf16.msra.mxu1 %v2336_v43  ;;  %2166 = vmatpush3.bf16.msra.mxu0 %v2344_v62 }
 0x681   :  { %2147 = vmatprep.subr.bf16.mxu1 %v2572_v57  ;;  %2167 = vmatprep.subr.bf16.mxu0 %v2572_v57 }
 0x684   :  { %2148 = vmatpush3.bf16.msra.mxu1 %v2337_v55  ;;  %2168 = vmatpush3.bf16.msra.mxu0 %v2345_v26 }
 0x685   :  { %2149 = vmatprep.subr.bf16.mxu1 %v2572_v57  ;;  %2169 = vmatprep.subr.bf16.mxu0 %v2572_v57 }
 0x688   :  { %2150 = vmatpush3.bf16.msra.mxu1 %v2338_v51  ;;  %2170 = vmatpush3.bf16.msra.mxu0 %v2346_v27 }
 0x72a   :  { %v1570_v1 = vpop.f32.mrf.mxu1  ;;  %v1611_v4 = vpop.f32.mrf.mxu0 }
 0x72b   :  { %v1622_v32 = vrot.slane %v1570_v1, 2  ;;  %v1624_v7 = vrot.slane %v1611_v4, 2 }
 0x72c   :  { %v1572_v36 = vpop.f32.mrf.mxu1  ;;  %v1613_v34 = vpop.f32.mrf.mxu0 }
 0x72d   :  { %v1630_v38 = vadd.f32 %v1622_v32, %v2914_v47  ;;  %v1623_v40 = vrot.slane %v1572_v36, 2  ;;  %v1632_v8 = vadd.f32 %v1624_v7, %v2920_v37  ;;  %v1625_v9 = vrot.slane %v1613_v34, 2 }
 0x72e   :  { %v1574_v42 = vpop.f32.mrf.mxu1  ;;  %v1615_v6 = vpop.f32.mrf.mxu0 }
 0x72f   :  { %v2033_v63 = vmul.f32 -1.442695, %v1630_v38  ;;  %v1631_v0 = vadd.f32 %v1623_v40, %v2916_v52  ;;  %v2035_v10 = vmul.f32 -1.442695, %v1632_v8  ;;  %v1633_v12 = vadd.f32 %v1625_v9, %v2923_v39 }
 0x730   :  { %v1575_v2 = vpop.f32.mrf.mxu1  ;;  %v1616_v3 = vpop.f32.mrf.mxu0 }
 0x731   :  { %2395 = vpow2.f32 %v2033_v63  ;;  %v2034_v5 = vmul.f32 -1.442695, %v1631_v0 }
 0x733   :  { %2397 = vpow2.f32 %v2034_v5 }
 0x734   :  { %2399 = vpow2.f32 %v2035_v10 }
 0x73e   :  { %v2396_v11 = vpop.eup %2395 }
 0x73f   :  { %v1643_v47 = vadd.f32 1.0, %v2396_v11 }
 0x740   :  { %v2398_v13 = vpop.eup %2397 }
 0x741   :  { %2401 = vrcp.f32 %v1643_v47  ;;  %v1644_v14 = vadd.f32 1.0, %v2398_v13  ;;  %v2400_v52 = vpop.eup %2399 }
 0x742   :  { %2403 = vtanh.f32 %v1633_v12  ;;  %v1645_v19 = vadd.f32 1.0, %v2400_v52 }
 0x743   :  { %2405 = vrcp.f32 %v1644_v14 }
 0x744   :  { %2407 = vrcp.f32 %v1645_v19 }
 0x74e   :  { %v2402_v15 = vpop.eup %2401 }
 0x74f   :  { %v2404_v16 = vpop.eup %2403 }
 0x750   :  { %v2406_v18 = vpop.eup %2405  ;;  %v1657_v20 = vmul.f32 %v2404_v16, %v2402_v15 }
 0x751   :  { %v1656_v37 = vmul.f32 %v2406_v18, %v1654_v17  ;;  %v2408_v39 = vpop.eup %2407 }
 0x753   :  { %v1658_v21 = vadd.f32 %v1657_v20, %v1656_v37 }
 0x755   :  { %2409 = vtanh.f32 %v1658_v21 }
 0x762   :  { %v2410_v22 = vpop.eup %2409 }
 0x763   :  { %v1660_v23 = vmul.f32 %v2410_v22, %v2408_v39 }
 0x765   :  { %v1677_v24 = vpack.c.bf16 %v1660_v23, %v1660_v23 }
 0x767   :  { %v1685_v25 = vrot.slane %v1677_v24, 3 }
 0x769   :  { %2152 = vmatmul.mubr.bf16.vlgmr.msra.gmra.mxu1 %v1685_v25 }
 0x829   :  { %v1769_v29 = vpop.f32.mrf.mxu1 }
 0x82a   :  { %v1770_v30 = vadd.f32 %v2036_v28, %v1769_v29 }
 0x82b   :  { %v2153_v31 = vpop.f32.mrf.mxu1 }
 0x82c   :  { %v1775_v35 = vmax.f32 %v1770_v30, 0.0 }
 0x82d   :  { %v1772_v44 = vpop.f32.mrf.mxu1 }
 0x82e   :  { %v1792_v45 = vpack.c.bf16 %v1775_v35, %v1775_v35 }
 0x82f   :  { %v2154_v46 = vpop.f32.mrf.mxu1 }
 0x830   :  { %2172 = vmatmul.mubr.bf16.vlgmr.msra.gmra.mxu0 %v1792_v45 }
 0x8f0   :  { %v1881_v57 = vpop.f32.mrf.mxu0 }
 0x8f1   :  { %v1882_v48 = vadd.f32 %v2045_v50, %v1881_v57 }
 0x8f2   :  { %v2173_v49 = vpop.f32.mrf.mxu0 }
 0x8f3   :  { %1887 = vst [vmem:[#allocation13] sm:$0x3] %v1882_v48 }
 0x8f4   :  { %v1884_v53 = vpop.f32.mrf.mxu0 }
 0x8f5   :  { %2542 = shalt.err (!%p2539_p6)
}
 0x8f6   :  { %1897 = dma.vmem_to_hbm [thread:$0]  %s1895_s24, 32, %s3054_s9, [#allocation4]   ;;  %v2174_v41 = vpop.f32.mrf.mxu0 }
 0x8f7   :  { %2559 = dma.done.wait [#allocation4], 32  }
 0x8f8   :  { %2560 = vsyncadd [#allocation4], 4294967264 }
 0x8f9   :  { %1901 = vsyncpa [#allocation3], 1 }
 0x8fa   :  { %1902 = vsyncpa [#allocation6], 1 }
 0x8fb   :  { %1903 = vsyncpa [#allocation9], 1 }
 0x8fc   :  { %1904 = vsyncpa [#allocation12], 1 }
 0x8fd   :  { %1905 = vsyncpa [#allocation4], 1 }

</bundles_post_ra>
